<compile_context>
chip_gen: v7x
topology: tpu7x:2x2x1
jax: 0.10.0
libtpu: 0.0.40
codegen_flags: <defaults>
</compile_context>

<pallas_src>
import jax
import jax.numpy as jnp
from jax.experimental import pallas as pl
from jax.experimental.pallas import tpu as pltpu


# ---------------------------------------------------------------------------
# Hardware probes (best-effort; always safe fallbacks)
# ---------------------------------------------------------------------------
def _device_kind():
    try:
        return jax.devices()[0].device_kind.lower()
    except Exception:
        return ""


def _num_tensorcores_per_chip():
    # v7x exposes 2 TensorCores per chip (grid axes marked "parallel" shard
    # across them); v5e/v6e have a single TC.
    return 2 if "v7" in _device_kind() else 1


def _is_v5e():
    k = _device_kind()
    return ("v5e" in k) or ("v5 lite" in k) or ("v5lite" in k)


def _vmem_limit_bytes(default=32 << 20):
    try:
        cap = int(pltpu.get_tpu_info().vmem_capacity_bytes)
        return min(default, cap // 2)
    except Exception:
        return default


# ---------------------------------------------------------------------------
# Kernel
# ---------------------------------------------------------------------------
def _mlp_kernel(z_ref, w_in_ref, w_h_ref, w_out_ref, b_ref, out_ref):
    """One batch tile of the fused MLP.

    Weights are bf16 MXU operands; accumulation is f32; the bias/ReLU epilogue
    runs in the bias dtype (bf16 on v6e/v7x, f32 on v5e).  The batch tile is
    split into two independent row groups so one group's VPU epilogue overlaps
    the other group's MXU streaming (the kernel is dependency-latency bound,
    not slot bound).
    """
    cdt = w_in_ref.dtype          # MXU operand dtype (bf16)
    edt = b_ref.dtype             # epilogue dtype (bf16 on v6e/v7x, f32 on v5e)
    H = w_in_ref.shape[1]
    L = w_h_ref.shape[0]
    x_dim = w_out_ref.shape[1]
    tb = z_ref.shape[0]

    biases = b_ref[...]                                   # (L+2, W)
    b_in = biases[0:1, :H]                                # (1, H)
    b_out = biases[L + 1:L + 2, :x_dim].astype(jnp.float32)

    # Independent row groups (2 if the tile is big enough, else 1).
    n_groups = 2 if (tb >= 16 and tb % 16 == 0) else 1
    rg = tb // n_groups
    hs = [z_ref[g * rg:(g + 1) * rg, :].astype(cdt) for g in range(n_groups)]

    def layer(hs, w, b):
        # Issue all (independent) dots first, then all epilogues, giving the
        # LLO scheduler two chains to interleave: group-0 epilogue on the VPU
        # while group-1 rows are still in the MXU.
        ys = [jnp.dot(h, w, preferred_element_type=jnp.float32) for h in hs]
        return [jnp.maximum(y.astype(edt) + b, 0.0).astype(cdt) for y in ys]

    # Input layer: Linear(z_dim -> H) + ReLU.
    hs = layer(hs, w_in_ref[...], b_in)

    # Hidden layers, statically unrolled (activations stay in registers; no
    # VMEM scratch round-trip on the critical path).
    for l in range(L):
        hs = layer(hs, w_h_ref[l], biases[l + 1:l + 2, :H])

    # Output layer (no activation), written straight to the narrow output.
    w_out = w_out_ref[...]
    for g in range(n_groups):
        y = jnp.dot(hs[g], w_out, preferred_element_type=jnp.float32)
        out_ref[g * rg:(g + 1) * rg, :] = (y + b_out).astype(out_ref.dtype)


# ---------------------------------------------------------------------------
# Parameter packing / wrapper
# ---------------------------------------------------------------------------
def pack_params(params, compute_dtype=jnp.bfloat16, epilogue_dtype=None):
    """Cast weights to the MXU compute dtype and pack all biases into one
    (L+2, max(H, x_dim)) tensor in the epilogue dtype."""
    if epilogue_dtype is None:
        # v5e's VPU has no native bf16 -> keep the epilogue in f32 there.
        epilogue_dtype = jnp.float32 if _is_v5e() else jnp.bfloat16

    H = params["w_in"].shape[1]
    L = params["w_h"].shape[0]
    x_dim = params["w_out"].shape[1]
    W = max(H, x_dim)

    b_all = jnp.zeros((L + 2, W), jnp.float32)
    b_all = b_all.at[0, :H].set(params["b_in"].reshape(H))
    b_all = b_all.at[1:L + 1, :H].set(params["b_h"].reshape(L, H))
    b_all = b_all.at[L + 1, :x_dim].set(params["b_out"].reshape(x_dim))

    return {
        "w_in": params["w_in"].astype(compute_dtype),
        "w_h": params["w_h"].astype(compute_dtype),
        "w_out": params["w_out"].astype(compute_dtype),
        "b_all": b_all.astype(epilogue_dtype),
    }


def generator_forward(z, packed, *, batch_tile=None):
    """Run the fused MLP generator.  z: (B, z_dim) f32 -> (B, x_dim) f32."""
    B, z_dim = z.shape
    H = packed["w_in"].shape[1]
    L = packed["w_h"].shape[0]
    x_dim = packed["w_out"].shape[1]
    n_bias, W = packed["b_all"].shape

    # One tile per TensorCore: grid=(1,) on single-TC v5e/v6e, two tiles on v7x.
    if batch_tile is None:
        batch_tile = max(8, B // _num_tensorcores_per_chip())
    tb = min(batch_tile, B)
    if B % tb != 0 or tb % 8 != 0:
        tb = B  # fall back to a single tile
    grid = (B // tb,)

    # VMEM budget guard (pipeliner may double-buffer even constant-index
    # weight blocks).  TODO(synk): stream w_h per-layer when this trips.
    itemsize = jnp.dtype(packed["w_in"].dtype).itemsize
    weight_bytes = (z_dim * H + L * H * H + H * x_dim) * itemsize
    bias_bytes = n_bias * W * jnp.dtype(packed["b_all"].dtype).itemsize
    io_bytes = tb * (z_dim + x_dim) * 4
    vmem_limit = _vmem_limit_bytes()
    assert 2 * (weight_bytes + bias_bytes + io_bytes) < vmem_limit, (
        "stacked weights exceed VMEM budget; switch w_h to a streamed "
        "per-layer grid axis / emit_pipeline")

    out = pl.pallas_call(
        _mlp_kernel,
        out_shape=jax.ShapeDtypeStruct((B, x_dim), jnp.float32),
        grid=grid,
        in_specs=[
            pl.BlockSpec((tb, z_dim), lambda i: (i, 0)),        # z (batch-tiled)
            pl.BlockSpec((z_dim, H), lambda i: (0, 0)),         # w_in
            pl.BlockSpec((L, H, H), lambda i: (0, 0, 0)),       # w_h (stacked)
            pl.BlockSpec((H, x_dim), lambda i: (0, 0)),         # w_out
            pl.BlockSpec((n_bias, W), lambda i: (0, 0)),        # all biases
        ],
        out_specs=pl.BlockSpec((tb, x_dim), lambda i: (i, 0)),
        compiler_params=pltpu.CompilerParams(
            # Batch-tile axis is embarrassingly parallel -> megacore sharding
            # on v7x (2 TCs); harmless on single-TC v5e/v6e (grid is (1,)).
            dimension_semantics=("parallel",),
            vmem_limit_bytes=vmem_limit,
        ),
    )(z, packed["w_in"], packed["w_h"], packed["w_out"], packed["b_all"])

    return out


# ---------------------------------------------------------------------------
# Init + reference (identical dtype policy to the kernel)
# ---------------------------------------------------------------------------
def init_params(key, z_dim, x_dim, n_hidden_layers, n_hidden_nodes):
    """PyTorch-style uniform(-1/sqrt(fan_in), 1/sqrt(fan_in)) init."""
    H, L = n_hidden_nodes, n_hidden_layers
    ks = jax.random.split(key, 6)

    def unif(k, shape, fan_in):
        bound = 1.0 / jnp.sqrt(float(fan_in))
        return jax.random.uniform(k, shape, jnp.float32, -bound, bound)

    return {
        "w_in": unif(ks[0], (z_dim, H), z_dim),
        "b_in": unif(ks[1], (1, H), z_dim),
        "w_h": unif(ks[2], (L, H, H), H),
        "b_h": unif(ks[3], (L, 1, H), H),
        "w_out": unif(ks[4], (H, x_dim), H),
        "b_out": unif(ks[5], (1, x_dim), H),
    }


def reference_forward(z, packed):
    """Pure-JAX reference with exactly the kernel's dtype policy (bf16 MXU
    operands, f32 accumulation, bf16/f32 epilogue) — same structure as the
    PyTorch nn.Sequential, layer for layer."""
    cdt = packed["w_in"].dtype
    edt = packed["b_all"].dtype
    H = packed["w_in"].shape[1]
    L = packed["w_h"].shape[0]
    x_dim = packed["w_out"].shape[1]
    b = packed["b_all"]

    h = jnp.dot(z.astype(cdt), packed["w_in"], preferred_element_type=jnp.float32)
    h = jnp.maximum(h.astype(edt) + b[0:1, :H], 0.0).astype(cdt)
    for l in range(L):
        hl = jnp.dot(h, packed["w_h"][l], preferred_element_type=jnp.float32)
        h = jnp.maximum(hl.astype(edt) + b[l + 1:l + 2, :H], 0.0).astype(cdt)
    y = jnp.dot(h, packed["w_out"], preferred_element_type=jnp.float32)
    return y + b[L + 1:L + 2, :x_dim].astype(jnp.float32)


if __name__ == "__main__":
    # Generator(z_dim=16, x_dim=8, n_hidden_layers=8, n_hidden_nodes=128),
    # batch 256 (single tile on v5e/v6e, two 128-row tiles on v7x).
    z_dim, x_dim = 16, 8
    n_hidden_layers, n_hidden_nodes = 8, 128
    batch = 256

    key = jax.random.PRNGKey(0)
    k_params, k_z = jax.random.split(key)
    params = init_params(k_params, z_dim, x_dim, n_hidden_layers, n_hidden_nodes)
    z = jax.random.normal(k_z, (batch, z_dim), jnp.float32)

    packed = pack_params(params)

    out = generator_forward(z, packed)
    out = jax.block_until_ready(out)

    ref = reference_forward(z, packed)
    assert out.shape == (batch, x_dim)
    assert jnp.allclose(out, ref, atol=1e-2, rtol=1e-2), "mismatch vs reference"

    print("KERNEL_OK")
</pallas_src>

<mosaic_0001>
module attributes {stable_mosaic.version = 11 : i64} {
  func.func @_mlp_kernel(%arg0: i32, %arg1: memref<256x16xf32, #tpu.memory_space<vmem>>, %arg2: memref<16x128xbf16, #tpu.memory_space<vmem>>, %arg3: memref<8x128x128xbf16, #tpu.memory_space<vmem>>, %arg4: memref<128x8xbf16, #tpu.memory_space<vmem>>, %arg5: memref<10x128xbf16, #tpu.memory_space<vmem>>, %arg6: memref<256x8xf32, #tpu.memory_space<vmem>>) attributes {dimension_semantics = [#tpu.dimension_semantics<parallel>], iteration_bounds = array<i64: 1>, scalar_prefetch = 0 : i64, scratch_operands = 0 : i64, tpu.core_type = #tpu.core_type<tc>, window_params = [{transform_indices = @transform_0, window_bounds = array<i64: 256, 16>}, {pipeline_mode = #tpu.pipeline_mode<synchronous>, transform_indices = @transform_1, window_bounds = array<i64: 16, 128>}, {pipeline_mode = #tpu.pipeline_mode<synchronous>, transform_indices = @transform_2, window_bounds = array<i64: 8, 128, 128>}, {pipeline_mode = #tpu.pipeline_mode<synchronous>, transform_indices = @transform_3, window_bounds = array<i64: 128, 8>}, {pipeline_mode = #tpu.pipeline_mode<synchronous>, transform_indices = @transform_4, window_bounds = array<i64: 10, 128>}, {transform_indices = @transform_5, window_bounds = array<i64: 256, 8>}]} {
    %c0 = arith.constant 0 : index
    %c0_0 = arith.constant 0 : index
    %0 = vector.load %arg5[%c0, %c0_0] : memref<10x128xbf16, #tpu.memory_space<vmem>>, vector<10x128xbf16>
    %1 = vector.extract_strided_slice %0 {offsets = [0, 0], sizes = [1, 128], strides = [1, 1]} : vector<10x128xbf16> to vector<1x128xbf16>
    %2 = vector.extract_strided_slice %0 {offsets = [9, 0], sizes = [1, 8], strides = [1, 1]} : vector<10x128xbf16> to vector<1x8xbf16>
    %3 = arith.extf %2 : vector<1x8xbf16> to vector<1x8xf32>
    %c0_1 = arith.constant 0 : index
    %c0_2 = arith.constant 0 : index
    %4 = vector.load %arg1[%c0_1, %c0_2] : memref<256x16xf32, #tpu.memory_space<vmem>>, vector<128x16xf32>
    %5 = arith.truncf %4 : vector<128x16xf32> to vector<128x16xbf16>
    %c128 = arith.constant 128 : index
    %c0_3 = arith.constant 0 : index
    %6 = vector.load %arg1[%c128, %c0_3] : memref<256x16xf32, #tpu.memory_space<vmem>>, vector<128x16xf32>
    %7 = arith.truncf %6 : vector<128x16xf32> to vector<128x16xbf16>
    %c0_4 = arith.constant 0 : index
    %c0_5 = arith.constant 0 : index
    %8 = vector.load %arg2[%c0_4, %c0_5] : memref<16x128xbf16, #tpu.memory_space<vmem>>, vector<16x128xbf16>
    %cst = arith.constant dense<0.000000e+00> : vector<128x128xf32>
    %9 = tpu.matmul %5, %8, %cst {dimension_numbers = #tpu.dot_dimension_numbers<[1], [0], [0], [1], [0, 0, 1, 1], [], []>} : vector<128x16xbf16>, vector<16x128xbf16>, vector<128x128xf32> -> vector<128x128xf32>
    %cst_6 = arith.constant dense<0.000000e+00> : vector<128x128xf32>
    %10 = tpu.matmul %7, %8, %cst_6 {dimension_numbers = #tpu.dot_dimension_numbers<[1], [0], [0], [1], [0, 0, 1, 1], [], []>} : vector<128x16xbf16>, vector<16x128xbf16>, vector<128x128xf32> -> vector<128x128xf32>
    %11 = arith.truncf %9 : vector<128x128xf32> to vector<128x128xbf16>
    %12 = vector.broadcast %1 : vector<1x128xbf16> to vector<128x128xbf16>
    %13 = arith.addf %11, %12 : vector<128x128xbf16>
    %cst_7 = arith.constant 0.000000e+00 : bf16
    %14 = vector.broadcast %cst_7 : bf16 to vector<128x128xbf16>
    %15 = arith.maximumf %13, %14 : vector<128x128xbf16>
    %16 = arith.truncf %10 : vector<128x128xf32> to vector<128x128xbf16>
    %17 = vector.broadcast %1 : vector<1x128xbf16> to vector<128x128xbf16>
    %18 = arith.addf %16, %17 : vector<128x128xbf16>
    %cst_8 = arith.constant 0.000000e+00 : bf16
    %19 = vector.broadcast %cst_8 : bf16 to vector<128x128xbf16>
    %20 = arith.maximumf %18, %19 : vector<128x128xbf16>
    %c0_9 = arith.constant 0 : index
    %c0_10 = arith.constant 0 : index
    %c0_11 = arith.constant 0 : index
    %21 = vector.load %arg3[%c0_9, %c0_10, %c0_11] : memref<8x128x128xbf16, #tpu.memory_space<vmem>>, vector<1x128x128xbf16>
    %22 = vector.shape_cast %21 : vector<1x128x128xbf16> to vector<128x128xbf16>
    %23 = vector.extract_strided_slice %0 {offsets = [1, 0], sizes = [1, 128], strides = [1, 1]} : vector<10x128xbf16> to vector<1x128xbf16>
    %cst_12 = arith.constant dense<0.000000e+00> : vector<128x128xf32>
    %24 = tpu.matmul %15, %22, %cst_12 {dimension_numbers = #tpu.dot_dimension_numbers<[1], [0], [0], [1], [0, 0, 1, 1], [], []>} : vector<128x128xbf16>, vector<128x128xbf16>, vector<128x128xf32> -> vector<128x128xf32>
    %cst_13 = arith.constant dense<0.000000e+00> : vector<128x128xf32>
    %25 = tpu.matmul %20, %22, %cst_13 {dimension_numbers = #tpu.dot_dimension_numbers<[1], [0], [0], [1], [0, 0, 1, 1], [], []>} : vector<128x128xbf16>, vector<128x128xbf16>, vector<128x128xf32> -> vector<128x128xf32>
    %26 = arith.truncf %24 : vector<128x128xf32> to vector<128x128xbf16>
    %27 = vector.broadcast %23 : vector<1x128xbf16> to vector<128x128xbf16>
    %28 = arith.addf %26, %27 : vector<128x128xbf16>
    %cst_14 = arith.constant 0.000000e+00 : bf16
    %29 = vector.broadcast %cst_14 : bf16 to vector<128x128xbf16>
    %30 = arith.maximumf %28, %29 : vector<128x128xbf16>
    %31 = arith.truncf %25 : vector<128x128xf32> to vector<128x128xbf16>
    %32 = vector.broadcast %23 : vector<1x128xbf16> to vector<128x128xbf16>
    %33 = arith.addf %31, %32 : vector<128x128xbf16>
    %cst_15 = arith.constant 0.000000e+00 : bf16
    %34 = vector.broadcast %cst_15 : bf16 to vector<128x128xbf16>
    %35 = arith.maximumf %33, %34 : vector<128x128xbf16>
    %c1 = arith.constant 1 : index
    %c0_16 = arith.constant 0 : index
    %c0_17 = arith.constant 0 : index
    %36 = vector.load %arg3[%c1, %c0_16, %c0_17] : memref<8x128x128xbf16, #tpu.memory_space<vmem>>, vector<1x128x128xbf16>
    %37 = vector.shape_cast %36 : vector<1x128x128xbf16> to vector<128x128xbf16>
    %38 = vector.extract_strided_slice %0 {offsets = [2, 0], sizes = [1, 128], strides = [1, 1]} : vector<10x128xbf16> to vector<1x128xbf16>
    %cst_18 = arith.constant dense<0.000000e+00> : vector<128x128xf32>
    %39 = tpu.matmul %30, %37, %cst_18 {dimension_numbers = #tpu.dot_dimension_numbers<[1], [0], [0], [1], [0, 0, 1, 1], [], []>} : vector<128x128xbf16>, vector<128x128xbf16>, vector<128x128xf32> -> vector<128x128xf32>
    %cst_19 = arith.constant dense<0.000000e+00> : vector<128x128xf32>
    %40 = tpu.matmul %35, %37, %cst_19 {dimension_numbers = #tpu.dot_dimension_numbers<[1], [0], [0], [1], [0, 0, 1, 1], [], []>} : vector<128x128xbf16>, vector<128x128xbf16>, vector<128x128xf32> -> vector<128x128xf32>
    %41 = arith.truncf %39 : vector<128x128xf32> to vector<128x128xbf16>
    %42 = vector.broadcast %38 : vector<1x128xbf16> to vector<128x128xbf16>
    %43 = arith.addf %41, %42 : vector<128x128xbf16>
    %cst_20 = arith.constant 0.000000e+00 : bf16
    %44 = vector.broadcast %cst_20 : bf16 to vector<128x128xbf16>
    %45 = arith.maximumf %43, %44 : vector<128x128xbf16>
    %46 = arith.truncf %40 : vector<128x128xf32> to vector<128x128xbf16>
    %47 = vector.broadcast %38 : vector<1x128xbf16> to vector<128x128xbf16>
    %48 = arith.addf %46, %47 : vector<128x128xbf16>
    %cst_21 = arith.constant 0.000000e+00 : bf16
    %49 = vector.broadcast %cst_21 : bf16 to vector<128x128xbf16>
    %50 = arith.maximumf %48, %49 : vector<128x128xbf16>
    %c2 = arith.constant 2 : index
    %c0_22 = arith.constant 0 : index
    %c0_23 = arith.constant 0 : index
    %51 = vector.load %arg3[%c2, %c0_22, %c0_23] : memref<8x128x128xbf16, #tpu.memory_space<vmem>>, vector<1x128x128xbf16>
    %52 = vector.shape_cast %51 : vector<1x128x128xbf16> to vector<128x128xbf16>
    %53 = vector.extract_strided_slice %0 {offsets = [3, 0], sizes = [1, 128], strides = [1, 1]} : vector<10x128xbf16> to vector<1x128xbf16>
    %cst_24 = arith.constant dense<0.000000e+00> : vector<128x128xf32>
    %54 = tpu.matmul %45, %52, %cst_24 {dimension_numbers = #tpu.dot_dimension_numbers<[1], [0], [0], [1], [0, 0, 1, 1], [], []>} : vector<128x128xbf16>, vector<128x128xbf16>, vector<128x128xf32> -> vector<128x128xf32>
    %cst_25 = arith.constant dense<0.000000e+00> : vector<128x128xf32>
    %55 = tpu.matmul %50, %52, %cst_25 {dimension_numbers = #tpu.dot_dimension_numbers<[1], [0], [0], [1], [0, 0, 1, 1], [], []>} : vector<128x128xbf16>, vector<128x128xbf16>, vector<128x128xf32> -> vector<128x128xf32>
    %56 = arith.truncf %54 : vector<128x128xf32> to vector<128x128xbf16>
    %57 = vector.broadcast %53 : vector<1x128xbf16> to vector<128x128xbf16>
    %58 = arith.addf %56, %57 : vector<128x128xbf16>
    %cst_26 = arith.constant 0.000000e+00 : bf16
    %59 = vector.broadcast %cst_26 : bf16 to vector<128x128xbf16>
    %60 = arith.maximumf %58, %59 : vector<128x128xbf16>
    %61 = arith.truncf %55 : vector<128x128xf32> to vector<128x128xbf16>
    %62 = vector.broadcast %53 : vector<1x128xbf16> to vector<128x128xbf16>
    %63 = arith.addf %61, %62 : vector<128x128xbf16>
    %cst_27 = arith.constant 0.000000e+00 : bf16
    %64 = vector.broadcast %cst_27 : bf16 to vector<128x128xbf16>
    %65 = arith.maximumf %63, %64 : vector<128x128xbf16>
    %c3 = arith.constant 3 : index
    %c0_28 = arith.constant 0 : index
    %c0_29 = arith.constant 0 : index
    %66 = vector.load %arg3[%c3, %c0_28, %c0_29] : memref<8x128x128xbf16, #tpu.memory_space<vmem>>, vector<1x128x128xbf16>
    %67 = vector.shape_cast %66 : vector<1x128x128xbf16> to vector<128x128xbf16>
    %68 = vector.extract_strided_slice %0 {offsets = [4, 0], sizes = [1, 128], strides = [1, 1]} : vector<10x128xbf16> to vector<1x128xbf16>
    %cst_30 = arith.constant dense<0.000000e+00> : vector<128x128xf32>
    %69 = tpu.matmul %60, %67, %cst_30 {dimension_numbers = #tpu.dot_dimension_numbers<[1], [0], [0], [1], [0, 0, 1, 1], [], []>} : vector<128x128xbf16>, vector<128x128xbf16>, vector<128x128xf32> -> vector<128x128xf32>
    %cst_31 = arith.constant dense<0.000000e+00> : vector<128x128xf32>
    %70 = tpu.matmul %65, %67, %cst_31 {dimension_numbers = #tpu.dot_dimension_numbers<[1], [0], [0], [1], [0, 0, 1, 1], [], []>} : vector<128x128xbf16>, vector<128x128xbf16>, vector<128x128xf32> -> vector<128x128xf32>
    %71 = arith.truncf %69 : vector<128x128xf32> to vector<128x128xbf16>
    %72 = vector.broadcast %68 : vector<1x128xbf16> to vector<128x128xbf16>
    %73 = arith.addf %71, %72 : vector<128x128xbf16>
    %cst_32 = arith.constant 0.000000e+00 : bf16
    %74 = vector.broadcast %cst_32 : bf16 to vector<128x128xbf16>
    %75 = arith.maximumf %73, %74 : vector<128x128xbf16>
    %76 = arith.truncf %70 : vector<128x128xf32> to vector<128x128xbf16>
    %77 = vector.broadcast %68 : vector<1x128xbf16> to vector<128x128xbf16>
    %78 = arith.addf %76, %77 : vector<128x128xbf16>
    %cst_33 = arith.constant 0.000000e+00 : bf16
    %79 = vector.broadcast %cst_33 : bf16 to vector<128x128xbf16>
    %80 = arith.maximumf %78, %79 : vector<128x128xbf16>
    %c4 = arith.constant 4 : index
    %c0_34 = arith.constant 0 : index
    %c0_35 = arith.constant 0 : index
    %81 = vector.load %arg3[%c4, %c0_34, %c0_35] : memref<8x128x128xbf16, #tpu.memory_space<vmem>>, vector<1x128x128xbf16>
    %82 = vector.shape_cast %81 : vector<1x128x128xbf16> to vector<128x128xbf16>
    %83 = vector.extract_strided_slice %0 {offsets = [5, 0], sizes = [1, 128], strides = [1, 1]} : vector<10x128xbf16> to vector<1x128xbf16>
    %cst_36 = arith.constant dense<0.000000e+00> : vector<128x128xf32>
    %84 = tpu.matmul %75, %82, %cst_36 {dimension_numbers = #tpu.dot_dimension_numbers<[1], [0], [0], [1], [0, 0, 1, 1], [], []>} : vector<128x128xbf16>, vector<128x128xbf16>, vector<128x128xf32> -> vector<128x128xf32>
    %cst_37 = arith.constant dense<0.000000e+00> : vector<128x128xf32>
    %85 = tpu.matmul %80, %82, %cst_37 {dimension_numbers = #tpu.dot_dimension_numbers<[1], [0], [0], [1], [0, 0, 1, 1], [], []>} : vector<128x128xbf16>, vector<128x128xbf16>, vector<128x128xf32> -> vector<128x128xf32>
    %86 = arith.truncf %84 : vector<128x128xf32> to vector<128x128xbf16>
    %87 = vector.broadcast %83 : vector<1x128xbf16> to vector<128x128xbf16>
    %88 = arith.addf %86, %87 : vector<128x128xbf16>
    %cst_38 = arith.constant 0.000000e+00 : bf16
    %89 = vector.broadcast %cst_38 : bf16 to vector<128x128xbf16>
    %90 = arith.maximumf %88, %89 : vector<128x128xbf16>
    %91 = arith.truncf %85 : vector<128x128xf32> to vector<128x128xbf16>
    %92 = vector.broadcast %83 : vector<1x128xbf16> to vector<128x128xbf16>
    %93 = arith.addf %91, %92 : vector<128x128xbf16>
    %cst_39 = arith.constant 0.000000e+00 : bf16
    %94 = vector.broadcast %cst_39 : bf16 to vector<128x128xbf16>
    %95 = arith.maximumf %93, %94 : vector<128x128xbf16>
    %c5 = arith.constant 5 : index
    %c0_40 = arith.constant 0 : index
    %c0_41 = arith.constant 0 : index
    %96 = vector.load %arg3[%c5, %c0_40, %c0_41] : memref<8x128x128xbf16, #tpu.memory_space<vmem>>, vector<1x128x128xbf16>
    %97 = vector.shape_cast %96 : vector<1x128x128xbf16> to vector<128x128xbf16>
    %98 = vector.extract_strided_slice %0 {offsets = [6, 0], sizes = [1, 128], strides = [1, 1]} : vector<10x128xbf16> to vector<1x128xbf16>
    %cst_42 = arith.constant dense<0.000000e+00> : vector<128x128xf32>
    %99 = tpu.matmul %90, %97, %cst_42 {dimension_numbers = #tpu.dot_dimension_numbers<[1], [0], [0], [1], [0, 0, 1, 1], [], []>} : vector<128x128xbf16>, vector<128x128xbf16>, vector<128x128xf32> -> vector<128x128xf32>
    %cst_43 = arith.constant dense<0.000000e+00> : vector<128x128xf32>
    %100 = tpu.matmul %95, %97, %cst_43 {dimension_numbers = #tpu.dot_dimension_numbers<[1], [0], [0], [1], [0, 0, 1, 1], [], []>} : vector<128x128xbf16>, vector<128x128xbf16>, vector<128x128xf32> -> vector<128x128xf32>
    %101 = arith.truncf %99 : vector<128x128xf32> to vector<128x128xbf16>
    %102 = vector.broadcast %98 : vector<1x128xbf16> to vector<128x128xbf16>
    %103 = arith.addf %101, %102 : vector<128x128xbf16>
    %cst_44 = arith.constant 0.000000e+00 : bf16
    %104 = vector.broadcast %cst_44 : bf16 to vector<128x128xbf16>
    %105 = arith.maximumf %103, %104 : vector<128x128xbf16>
    %106 = arith.truncf %100 : vector<128x128xf32> to vector<128x128xbf16>
    %107 = vector.broadcast %98 : vector<1x128xbf16> to vector<128x128xbf16>
    %108 = arith.addf %106, %107 : vector<128x128xbf16>
    %cst_45 = arith.constant 0.000000e+00 : bf16
    %109 = vector.broadcast %cst_45 : bf16 to vector<128x128xbf16>
    %110 = arith.maximumf %108, %109 : vector<128x128xbf16>
    %c6 = arith.constant 6 : index
    %c0_46 = arith.constant 0 : index
    %c0_47 = arith.constant 0 : index
    %111 = vector.load %arg3[%c6, %c0_46, %c0_47] : memref<8x128x128xbf16, #tpu.memory_space<vmem>>, vector<1x128x128xbf16>
    %112 = vector.shape_cast %111 : vector<1x128x128xbf16> to vector<128x128xbf16>
    %113 = vector.extract_strided_slice %0 {offsets = [7, 0], sizes = [1, 128], strides = [1, 1]} : vector<10x128xbf16> to vector<1x128xbf16>
    %cst_48 = arith.constant dense<0.000000e+00> : vector<128x128xf32>
    %114 = tpu.matmul %105, %112, %cst_48 {dimension_numbers = #tpu.dot_dimension_numbers<[1], [0], [0], [1], [0, 0, 1, 1], [], []>} : vector<128x128xbf16>, vector<128x128xbf16>, vector<128x128xf32> -> vector<128x128xf32>
    %cst_49 = arith.constant dense<0.000000e+00> : vector<128x128xf32>
    %115 = tpu.matmul %110, %112, %cst_49 {dimension_numbers = #tpu.dot_dimension_numbers<[1], [0], [0], [1], [0, 0, 1, 1], [], []>} : vector<128x128xbf16>, vector<128x128xbf16>, vector<128x128xf32> -> vector<128x128xf32>
    %116 = arith.truncf %114 : vector<128x128xf32> to vector<128x128xbf16>
    %117 = vector.broadcast %113 : vector<1x128xbf16> to vector<128x128xbf16>
    %118 = arith.addf %116, %117 : vector<128x128xbf16>
    %cst_50 = arith.constant 0.000000e+00 : bf16
    %119 = vector.broadcast %cst_50 : bf16 to vector<128x128xbf16>
    %120 = arith.maximumf %118, %119 : vector<128x128xbf16>
    %121 = arith.truncf %115 : vector<128x128xf32> to vector<128x128xbf16>
    %122 = vector.broadcast %113 : vector<1x128xbf16> to vector<128x128xbf16>
    %123 = arith.addf %121, %122 : vector<128x128xbf16>
    %cst_51 = arith.constant 0.000000e+00 : bf16
    %124 = vector.broadcast %cst_51 : bf16 to vector<128x128xbf16>
    %125 = arith.maximumf %123, %124 : vector<128x128xbf16>
    %c7 = arith.constant 7 : index
    %c0_52 = arith.constant 0 : index
    %c0_53 = arith.constant 0 : index
    %126 = vector.load %arg3[%c7, %c0_52, %c0_53] : memref<8x128x128xbf16, #tpu.memory_space<vmem>>, vector<1x128x128xbf16>
    %127 = vector.shape_cast %126 : vector<1x128x128xbf16> to vector<128x128xbf16>
    %128 = vector.extract_strided_slice %0 {offsets = [8, 0], sizes = [1, 128], strides = [1, 1]} : vector<10x128xbf16> to vector<1x128xbf16>
    %cst_54 = arith.constant dense<0.000000e+00> : vector<128x128xf32>
    %129 = tpu.matmul %120, %127, %cst_54 {dimension_numbers = #tpu.dot_dimension_numbers<[1], [0], [0], [1], [0, 0, 1, 1], [], []>} : vector<128x128xbf16>, vector<128x128xbf16>, vector<128x128xf32> -> vector<128x128xf32>
    %cst_55 = arith.constant dense<0.000000e+00> : vector<128x128xf32>
    %130 = tpu.matmul %125, %127, %cst_55 {dimension_numbers = #tpu.dot_dimension_numbers<[1], [0], [0], [1], [0, 0, 1, 1], [], []>} : vector<128x128xbf16>, vector<128x128xbf16>, vector<128x128xf32> -> vector<128x128xf32>
    %131 = arith.truncf %129 : vector<128x128xf32> to vector<128x128xbf16>
    %132 = vector.broadcast %128 : vector<1x128xbf16> to vector<128x128xbf16>
    %133 = arith.addf %131, %132 : vector<128x128xbf16>
    %cst_56 = arith.constant 0.000000e+00 : bf16
    %134 = vector.broadcast %cst_56 : bf16 to vector<128x128xbf16>
    %135 = arith.maximumf %133, %134 : vector<128x128xbf16>
    %136 = arith.truncf %130 : vector<128x128xf32> to vector<128x128xbf16>
    %137 = vector.broadcast %128 : vector<1x128xbf16> to vector<128x128xbf16>
    %138 = arith.addf %136, %137 : vector<128x128xbf16>
    %cst_57 = arith.constant 0.000000e+00 : bf16
    %139 = vector.broadcast %cst_57 : bf16 to vector<128x128xbf16>
    %140 = arith.maximumf %138, %139 : vector<128x128xbf16>
    %c0_58 = arith.constant 0 : index
    %c0_59 = arith.constant 0 : index
    %141 = vector.load %arg4[%c0_58, %c0_59] : memref<128x8xbf16, #tpu.memory_space<vmem>>, vector<128x8xbf16>
    %cst_60 = arith.constant dense<0.000000e+00> : vector<128x8xf32>
    %142 = tpu.matmul %135, %141, %cst_60 {dimension_numbers = #tpu.dot_dimension_numbers<[1], [0], [0], [1], [0, 0, 1, 1], [], []>} : vector<128x128xbf16>, vector<128x8xbf16>, vector<128x8xf32> -> vector<128x8xf32>
    %143 = vector.broadcast %3 : vector<1x8xf32> to vector<128x8xf32>
    %144 = arith.addf %142, %143 : vector<128x8xf32>
    %c0_61 = arith.constant 0 : index
    %c0_62 = arith.constant 0 : index
    %145 = vector.load %arg6[%c0_61, %c0_62] : memref<256x8xf32, #tpu.memory_space<vmem>>, vector<128x8xf32>
    tpu.vector_store %arg6[%c0_61, %c0_62], %144 {strides = array<i32>} : memref<256x8xf32, #tpu.memory_space<vmem>>, vector<128x8xf32>,
    %cst_63 = arith.constant dense<0.000000e+00> : vector<128x8xf32>
    %146 = tpu.matmul %140, %141, %cst_63 {dimension_numbers = #tpu.dot_dimension_numbers<[1], [0], [0], [1], [0, 0, 1, 1], [], []>} : vector<128x128xbf16>, vector<128x8xbf16>, vector<128x8xf32> -> vector<128x8xf32>
    %147 = vector.broadcast %3 : vector<1x8xf32> to vector<128x8xf32>
    %148 = arith.addf %146, %147 : vector<128x8xf32>
    %c128_64 = arith.constant 128 : index
    %c0_65 = arith.constant 0 : index
    %149 = vector.load %arg6[%c128_64, %c0_65] : memref<256x8xf32, #tpu.memory_space<vmem>>, vector<128x8xf32>
    tpu.vector_store %arg6[%c128_64, %c0_65], %148 {strides = array<i32>} : memref<256x8xf32, #tpu.memory_space<vmem>>, vector<128x8xf32>,
    return
  }
  func.func @transform_0(%arg0: i32) -> (i32, i32) {
    %c0_i32 = arith.constant 0 : i32
    %c0_i32_0 = arith.constant 0 : i32
    return %arg0, %c0_i32 : i32, i32
  }
  func.func @transform_1(%arg0: i32) -> (i32, i32) {
    %c0_i32 = arith.constant 0 : i32
    %c0_i32_0 = arith.constant 0 : i32
    %c0_i32_1 = arith.constant 0 : i32
    return %c0_i32, %c0_i32_0 : i32, i32
  }
  func.func @transform_2(%arg0: i32) -> (i32, i32, i32) {
    %c0_i32 = arith.constant 0 : i32
    %c0_i32_0 = arith.constant 0 : i32
    %c0_i32_1 = arith.constant 0 : i32
    %c0_i32_2 = arith.constant 0 : i32
    return %c0_i32, %c0_i32_0, %c0_i32_1 : i32, i32, i32
  }
  func.func @transform_3(%arg0: i32) -> (i32, i32) {
    %c0_i32 = arith.constant 0 : i32
    %c0_i32_0 = arith.constant 0 : i32
    %c0_i32_1 = arith.constant 0 : i32
    return %c0_i32, %c0_i32_0 : i32, i32
  }
  func.func @transform_4(%arg0: i32) -> (i32, i32) {
    %c0_i32 = arith.constant 0 : i32
    %c0_i32_0 = arith.constant 0 : i32
    %c0_i32_1 = arith.constant 0 : i32
    return %c0_i32, %c0_i32_0 : i32, i32
  }
  func.func @transform_5(%arg0: i32) -> (i32, i32) {
    %c0_i32 = arith.constant 0 : i32
    %c0_i32_0 = arith.constant 0 : i32
    return %arg0, %c0_i32 : i32, i32
  }
}

</mosaic_0001>

<bundles_post_ra>
// kernel: tpu_custom_call.1
= control target key start
LH: loop header
LB: loop body
LE: loop exit
PB: predicated region body
PF: predicated region fallthrough
CT: control target
= control target key end

     0   :  { %10 = vsyncpa [#allocation3], 0  ;;  %s4293_s18 = smov [#allocation2]   ;;  %s4998_s0 = inlined_call_operand.vmem [shape: f32[256,16], index: 0, kind: input, shape index: {}]   ;;  %s4999_s1 = inlined_call_operand.vmem [shape: bf16[16,128], index: 1, kind: input, shape index: {}]   ;;  %s5000_s2 = inlined_call_operand.hbm [shape: bf16[8,128,128], index: 2, kind: input, shape index: {}]   ;;  %s5001_s3 = inlined_call_operand.vmem [shape: bf16[128,8], index: 3, kind: input, shape index: {}]   ;;  %s5002_s4 = inlined_call_operand.vmem [shape: bf16[10,128], index: 4, kind: input, shape index: {}]   ;;  %s5003_s5 = inlined_call_operand.vmem [shape: f32[256,8], index: 5, kind: output, shape index: {}]  }
   0x1   :  { %s20_s19 = sshll.u32 %s4293_s18, 4  ;;  %s4269_s22 = scalar_lea.hbm %s5000_s2, 8192  ;;  %s21_s19 = int_to_ptr.vmem [resolvable:$true] %s20_s19 }
   0x2   :  { %p4270_p0 = scmp.ne.s32.totalorder %s5000_s2, %s4269_s22  ;;  %p4273_p1 = scmp.lt.u32.totalorder %s4269_s22, %s5000_s2 }
   0x4   :  { %p4275_p2 = pnand %p4273_p1, %p4270_p0 }
   0x6   :  { %4278 = shalt.err (!%p4275_p2)
}
   0x7   :  { %s4279_s27 = scalar_lea.vmem %s21_s19, 8192  ;;  %p4284_p4 = scmp.lt.s32.totalorder %s21_s19, %s21_s19 }
   0x8   :  { %p4280_p3 = scmp.ne.s32.totalorder %s21_s19, %s4279_s27  ;;  %p4285_p5 = scmp.lt.s32.totalorder %s4279_s27, %s4279_s27 }
   0xa   :  { %p4286_p6 = por %p4285_p5, %p4284_p4 }
   0xc   :  { %p4287_p7 = pnand %p4286_p6, %p4280_p3 }
   0xe   :  { %4290 = shalt.err (!%p4287_p7)
}
   0xf   :  { %s4294_s28 = smov 64   ;;  %s4295_s29 = smov 4  }
  0x10   :  { %26 = dma.hbm_to_vmem [thread:$0]  %s5000_s2, 8192, %s21_s19, [#allocation3], %s4294_s28, %s4294_s28, %s4295_s29  }
  0x11   :  { %4291 = dma.done.wait [#allocation3], 8192  }
  0x12   :  { %4292 = vsyncadd [#allocation3], 4294959104  ;;  %v4196_v0 = vld [vmem:[%s4999_s1] sm:$0xff]   ;;  %v39_v2 = vld [vmem:[%s4998_s0 + $0x8] sm:$0xff]  ;;  %vm94_vm0 = vcmask 130048   ;;  %v348_v58 = vlaneseq  ;;  %vm3050_vm1 = vcmask 64512  }
  0x13   :  { %v38_v1 = vld [vmem:[%s4998_s0] sm:$0xff]  ;;  %3580 = vmatprep.subr.bf16.mxu0 %v4196_v0  ;;  %3598 = vmatprep.subr.bf16.mxu1 %v4196_v0  ;;  %v63_v5 = vld [vmem:[%s4998_s0 + $0x88] sm:$0xff]  ;;  %v40_v6 = vld [vmem:[%s4998_s0 + $0x10] sm:$0xff] }
  0x14   :  { %v62_v3 = vld [vmem:[%s4998_s0 + $0x80] sm:$0xff]  ;;  %v54_v4 = vpack.c.bf16 %v39_v2, %v38_v1  ;;  %v41_v7 = vld [vmem:[%s4998_s0 + $0x18] sm:$0xff]  ;;  %3581 = vmatpush3.bf16.msra.mxu0 %v4196_v0  ;;  %3599 = vmatpush3.bf16.msra.mxu1 %v4196_v0  ;;  %v64_v10 = vld [vmem:[%s4998_s0 + $0x90] sm:$0xff]  ;;  %v4454_v59 = vshrl.u32 %v348_v58, 7 }
  0x15   :  { %v78_v8 = vpack.c.bf16 %v63_v5, %v62_v3  ;;  %v55_v9 = vpack.c.bf16 %v41_v7, %v40_v6  ;;  %v65_v11 = vld [vmem:[%s4998_s0 + $0x98] sm:$0xff]  ;;  %v42_v12 = vld [vmem:[%s4998_s0 + $0x20] sm:$0xff]  ;;  %v43_v14 = vld [vmem:[%s4998_s0 + $0x28] sm:$0xff] }
  0x16   :  { %3582 = vmatprep.mubr.msk.bf16.mxu0 %vm94_vm0, %v54_v4  ;;  %v79_v13 = vpack.c.bf16 %v65_v11, %v64_v10  ;;  %v66_v15 = vld [vmem:[%s4998_s0 + $0xa0] sm:$0xff]  ;;  %v67_v16 = vld [vmem:[%s4998_s0 + $0xa8] sm:$0xff]  ;;  %v56_v17 = vpack.c.bf16 %v43_v14, %v42_v12  ;;  %v44_v19 = vld [vmem:[%s4998_s0 + $0x30] sm:$0xff]  ;;  %v4466_v62 = vsub.s32 0, %v4454_v59 }
  0x17   :  { %3600 = vmatprep.mubr.msk.bf16.mxu1 %vm94_vm0, %v78_v8  ;;  %v80_v18 = vpack.c.bf16 %v67_v16, %v66_v15  ;;  %3583 = vmatmul.mubr.msk.bf16.vlgmr.msra.gmra.mrb[0].mxu0 %vm94_vm0, %v55_v9  ;;  %v45_v20 = vld [vmem:[%s4998_s0 + $0x38] sm:$0xff]  ;;  %v68_v21 = vld [vmem:[%s4998_s0 + $0xb0] sm:$0xff]  ;;  %v46_v23 = vld [vmem:[%s4998_s0 + $0x40] sm:$0xff] }
  0x18   :  { %3601 = vmatmul.mubr.msk.bf16.vlgmr.msra.gmra.mrb[0].mxu1 %vm94_vm0, %v79_v13  ;;  %3586 = vmatprep.mubr.msk.bf16.mxu0 %vm94_vm0, %v56_v17  ;;  %v69_v22 = vld [vmem:[%s4998_s0 + $0xb8] sm:$0xff]  ;;  %v47_v24 = vld [vmem:[%s4998_s0 + $0x48] sm:$0xff]  ;;  %v70_v25 = vld [vmem:[%s4998_s0 + $0xc0] sm:$0xff]  ;;  %v57_v27 = vpack.c.bf16 %v45_v20, %v44_v19 }
  0x19   :  { %3604 = vmatprep.mubr.msk.bf16.mxu1 %vm94_vm0, %v80_v18  ;;  %v71_v26 = vld [vmem:[%s4998_s0 + $0xc8] sm:$0xff]  ;;  %v81_v28 = vpack.c.bf16 %v69_v22, %v68_v21  ;;  %v58_v29 = vpack.c.bf16 %v47_v24, %v46_v23  ;;  %v4197_v31 = vld [vmem:[#allocation2] sm:$0xff]   ;;  %v48_v32 = vld [vmem:[%s4998_s0 + $0x50] sm:$0xff]  ;;  %v4296_v18 = vmov 0  }
  0x1a   :  { %v82_v30 = vpack.c.bf16 %v71_v26, %v70_v25  ;;  %v49_v33 = vld [vmem:[%s4998_s0 + $0x58] sm:$0xff]  ;;  %v72_v34 = vld [vmem:[%s4998_s0 + $0xd0] sm:$0xff]  ;;  %v50_v36 = vld [vmem:[%s4998_s0 + $0x60] sm:$0xff]  ;;  %3616 = vmatprep.subr.bf16.mxu0 %v4197_v31  ;;  %3648 = vmatprep.subr.bf16.mxu1 %v4197_v31 }
  0x1b   :  { %v73_v35 = vld [vmem:[%s4998_s0 + $0xd8] sm:$0xff]  ;;  %v51_v37 = vld [vmem:[%s4998_s0 + $0x68] sm:$0xff]  ;;  %v74_v39 = vld [vmem:[%s4998_s0 + $0xe0] sm:$0xff]  ;;  %3617 = vmatpush3.bf16.msra.mxu0 %v4197_v31  ;;  %3649 = vmatpush3.bf16.msra.mxu1 %v4197_v31  ;;  %v59_v41 = vpack.c.bf16 %v49_v33, %v48_v32 }
  0x1c   :  { %v4198_v38 = vld [vmem:[#allocation2 + $0x8] sm:$0xff]   ;;  %v83_v42 = vpack.c.bf16 %v73_v35, %v72_v34  ;;  %v4199_v43 = vld [vmem:[#allocation2 + $0x10] sm:$0xff]   ;;  %v60_v44 = vpack.c.bf16 %v51_v37, %v50_v36  ;;  %v4200_v46 = vld [vmem:[#allocation2 + $0x18] sm:$0xff]  }
  0x1d   :  { %v75_v40 = vld [vmem:[%s4998_s0 + $0xe8] sm:$0xff]  ;;  %3618 = vmatprep.subr.bf16.mxu0 %v4198_v38  ;;  %3650 = vmatprep.subr.bf16.mxu1 %v4198_v38  ;;  %v52_v47 = vld [vmem:[%s4998_s0 + $0x70] sm:$0xff]  ;;  %v53_v48 = vld [vmem:[%s4998_s0 + $0x78] sm:$0xff] }
  0x1e   :  { %v84_v45 = vpack.c.bf16 %v75_v40, %v74_v39  ;;  %v76_v49 = vld [vmem:[%s4998_s0 + $0xf0] sm:$0xff]  ;;  %v77_v50 = vld [vmem:[%s4998_s0 + $0xf8] sm:$0xff]  ;;  %v4201_v51 = vld [vmem:[#allocation2 + $0x20] sm:$0xff]   ;;  %v61_v52 = vpack.c.bf16 %v53_v48, %v52_v47 }
  0x1f   :  { %3587 = vmatmul.mubr.msk.bf16.gmra.mrb[4].mxu0 %vm94_vm0, %v57_v27  ;;  %3651 = vmatpush3.bf16.msra.mxu1 %v4198_v38  ;;  %v85_v53 = vpack.c.bf16 %v77_v50, %v76_v49  ;;  %v4202_v54 = vld [vmem:[#allocation2 + $0x28] sm:$0xff]   ;;  %v4203_v55 = vld [vmem:[#allocation2 + $0x30] sm:$0xff]   ;;  %v4204_v56 = vld [vmem:[#allocation2 + $0x38] sm:$0xff]  }
  0x20   :  { %3605 = vmatmul.mubr.msk.bf16.gmra.mrb[4].mxu1 %vm94_vm0, %v81_v28  ;;  %3590 = vmatprep.mubr.msk.bf16.mxu0 %vm94_vm0, %v58_v29  ;;  %v4205_v57 = vld [vmem:[#allocation2 + $0x40] sm:$0xff]   ;;  %v4206_v25 = vld [vmem:[#allocation2 + $0x48] sm:$0xff]   ;;  %v4207_v36 = vld [vmem:[#allocation2 + $0x50] sm:$0xff]  }
  0x21   :  { %3608 = vmatprep.mubr.msk.bf16.mxu1 %vm94_vm0, %v82_v30  ;;  %3619 = vmatpush3.bf16.msra.mxu0 %v4198_v38  ;;  %v4459_v60 = vld [vmem:[%s5002_s4] sm:$0xf]  ;;  %v4208_v47 = vld [vmem:[#allocation2 + $0x58] sm:$0xff]  }
  0x22   :  { %3620 = vmatprep.subr.bf16.mxu0 %v4199_v43  ;;  %3652 = vmatprep.subr.bf16.mxu1 %v4199_v43  ;;  %v4463_v61 = vpack.i.b16 %v4459_v60, %v4459_v60  ;;  %v4209_v58 = vld [vmem:[#allocation2 + $0x60] sm:$0xff]  }
  0x23   :  { %3653 = vmatpush3.bf16.msra.mxu1 %v4199_v43 }
  0x24   :  { %3654 = vmatprep.subr.bf16.mxu1 %v4200_v46  ;;  %v4470_v3 = vrot.slane %v4463_v61, %v4466_v62 }
  0x25   :  { %3621 = vmatpush3.bf16.msra.mxu0 %v4199_v43 }
  0x26   :  { %3622 = vmatprep.subr.bf16.mxu0 %v4200_v46 }
  0x27   :  { %3591 = vmatmul.mubr.msk.bf16.gmra.mrb[8].mxu0 %vm94_vm0, %v59_v41  ;;  %3655 = vmatpush3.bf16.msra.mxu1 %v4200_v46 }
  0x28   :  { %3609 = vmatmul.mubr.msk.bf16.gmra.mrb[8].mxu1 %vm94_vm0, %v83_v42  ;;  %3594 = vmatprep.mubr.msk.bf16.mxu0 %vm94_vm0, %v60_v44 }
  0x29   :  { %3612 = vmatprep.mubr.msk.bf16.mxu1 %vm94_vm0, %v84_v45  ;;  %3623 = vmatpush3.bf16.msra.mxu0 %v4200_v46 }
  0x2a   :  { %3624 = vmatprep.subr.bf16.mxu0 %v4201_v51  ;;  %3656 = vmatprep.subr.bf16.mxu1 %v4201_v51 }
  0x2b   :  { %3657 = vmatpush3.bf16.msra.mxu1 %v4201_v51 }
  0x2c   :  { %3658 = vmatprep.subr.bf16.mxu1 %v4202_v54 }
  0x2d   :  { %3625 = vmatpush3.bf16.msra.mxu0 %v4201_v51 }
  0x2e   :  { %3626 = vmatprep.subr.bf16.mxu0 %v4202_v54 }
  0x2f   :  { %3595 = vmatmul.mubr.msk.bf16.gmra.mrb[12].mxu0 %vm94_vm0, %v61_v52  ;;  %3659 = vmatpush3.bf16.msra.mxu1 %v4202_v54 }
  0x30   :  { %3613 = vmatmul.mubr.msk.bf16.gmra.mrb[12].mxu1 %vm94_vm0, %v85_v53  ;;  %3660 = vmatprep.subr.bf16.mxu1 %v4203_v55 }
  0x31   :  { %3627 = vmatpush3.bf16.msra.mxu0 %v4202_v54 }
  0x32   :  { %3628 = vmatprep.subr.bf16.mxu0 %v4203_v55 }
  0x33   :  { %3661 = vmatpush3.bf16.msra.mxu1 %v4203_v55 }
  0x34   :  { %3662 = vmatprep.subr.bf16.mxu1 %v4204_v56 }
  0x35   :  { %3629 = vmatpush3.bf16.msra.mxu0 %v4203_v55 }
  0x36   :  { %3630 = vmatprep.subr.bf16.mxu0 %v4204_v56 }
  0x37   :  { %3663 = vmatpush3.bf16.msra.mxu1 %v4204_v56 }
  0x38   :  { %3712 = vmatprep.subr.bf16.mxu1 %v4205_v57 }
  0x39   :  { %3631 = vmatpush3.bf16.msra.mxu0 %v4204_v56 }
  0x3a   :  { %3680 = vmatprep.subr.bf16.mxu0 %v4205_v57 }
  0xea   :  { %v3584_v63 = vpop.f32.mrb[0].mxu0 }
  0xeb   :  { %v3602_v0 = vpop.f32.mrb[0].mxu1  ;;  %v153_v1 = vpop.f32.mrb[1].mxu0 }
  0xec   :  { %v274_v2 = vpop.f32.mrb[1].mxu1  ;;  %v3585_v4 = vpop.f32.mrb[2].mxu0 }
  0xed   :  { %v3603_v5 = vpop.f32.mrb[2].mxu1  ;;  %v338_v6 = vpack.c.bf16 %v3585_v4, %v3584_v63  ;;  %v156_v8 = vpop.f32.mrb[3].mxu0 }
  0xee   :  { %v369_v7 = vpack.c.bf16 %v3603_v5, %v3602_v0  ;;  %v277_v9 = vpop.f32.mrb[3].mxu1  ;;  %v337_v10 = vpack.c.bf16 %v156_v8, %v153_v1 }
  0xef   :  { %v368_v11 = vpack.c.bf16 %v277_v9, %v274_v2  ;;  %v353_v12 = vadd.bf16 %v4470_v3, %v338_v6 }
  0xf0   :  { %v377_v13 = vadd.bf16 %v369_v7, %v4470_v3  ;;  %v352_v14 = vadd.bf16 %v4470_v3, %v337_v10  ;;  %v4210_v10 = vld [vmem:[#allocation2 + $0x68] sm:$0xff]  }
  0xf1   :  { %v376_v15 = vadd.bf16 %v368_v11, %v4470_v3  ;;  %v361_v21 = vmax.bf16 %v4296_v18, %v353_v12 }
  0xf2   :  { %v3588_v16 = vpop.f32.mrb[4].mxu0  ;;  %v360_v19 = vmax.bf16 %v4296_v18, %v352_v14  ;;  %v385_v22 = vmax.bf16 %v4296_v18, %v377_v13 }
  0xf3   :  { %v3606_v17 = vpop.f32.mrb[4].mxu1  ;;  %v384_v20 = vmax.bf16 %v4296_v18, %v376_v15  ;;  %v169_v23 = vpop.f32.mrb[5].mxu0 }
  0xf4   :  { %v290_v24 = vpop.f32.mrb[5].mxu1  ;;  %v3589_v26 = vpop.f32.mrb[6].mxu0  ;;  %3632 = vmatprep.mubr.bf16.mxu0 %v360_v19 }
  0xf5   :  { %v3607_v27 = vpop.f32.mrb[6].mxu1  ;;  %3664 = vmatprep.mubr.bf16.mxu1 %v384_v20  ;;  %v340_v28 = vpack.c.bf16 %v3589_v26, %v3588_v16  ;;  %v172_v30 = vpop.f32.mrb[7].mxu0  ;;  %3633 = vmatmul.mubr.bf16.vlgmr.msra.gmra.mrb[16].mxu0 %v361_v21 }
  0xf6   :  { %v371_v29 = vpack.c.bf16 %v3607_v27, %v3606_v17  ;;  %v293_v31 = vpop.f32.mrb[7].mxu1  ;;  %3665 = vmatmul.mubr.bf16.vlgmr.msra.gmra.mrb[16].mxu1 %v385_v22  ;;  %v339_v32 = vpack.c.bf16 %v172_v30, %v169_v23  ;;  %3681 = vmatpush3.bf16.msra.mxu0 %v4205_v57  ;;  %v658_v30 = vshrl.u32 %v4459_v60, 16 }
  0xf7   :  { %v370_v33 = vpack.c.bf16 %v293_v31, %v290_v24  ;;  %3713 = vmatpush3.bf16.msra.mxu1 %v4205_v57  ;;  %v355_v34 = vadd.bf16 %v4470_v3, %v340_v28  ;;  %3682 = vmatprep.subr.bf16.mxu0 %v4206_v25  ;;  %v4211_v28 = vld [vmem:[#allocation2 + $0x70] sm:$0xff]  }
  0xf8   :  { %v379_v35 = vadd.bf16 %v371_v29, %v4470_v3  ;;  %3714 = vmatprep.subr.bf16.mxu1 %v4206_v25  ;;  %v354_v37 = vadd.bf16 %v4470_v3, %v339_v32  ;;  %v4213_v29 = vld [vmem:[#allocation2 + $0x80] sm:$0xff]   ;;  %v4505_v31 = vpack.i.b16 %v658_v30, %v658_v30 }
  0xf9   :  { %v378_v38 = vadd.bf16 %v370_v33, %v4470_v3  ;;  %v363_v45 = vmax.bf16 %v4296_v18, %v355_v34  ;;  %v4217_v30 = vld [vmem:[#allocation2 + $0xa0] sm:$0xff]  }
  0xfa   :  { %v3592_v39 = vpop.f32.mrb[8].mxu0  ;;  %v362_v41 = vmax.bf16 %v4296_v18, %v354_v37  ;;  %3683 = vmatpush3.bf16.msra.mxu0 %v4206_v25  ;;  %v387_v46 = vmax.bf16 %v4296_v18, %v379_v35 }
  0xfb   :  { %v3610_v40 = vpop.f32.mrb[8].mxu1  ;;  %v386_v42 = vmax.bf16 %v4296_v18, %v378_v38  ;;  %3715 = vmatpush3.bf16.msra.mxu1 %v4206_v25  ;;  %v185_v43 = vpop.f32.mrb[9].mxu0  ;;  %3684 = vmatprep.subr.bf16.mxu0 %v4207_v36 }
  0xfc   :  { %v306_v44 = vpop.f32.mrb[9].mxu1  ;;  %3716 = vmatprep.subr.bf16.mxu1 %v4207_v36  ;;  %v3593_v48 = vpop.f32.mrb[10].mxu0  ;;  %3636 = vmatprep.mubr.bf16.mxu0 %v362_v41 }
  0xfd   :  { %v3611_v49 = vpop.f32.mrb[10].mxu1  ;;  %3668 = vmatprep.mubr.bf16.mxu1 %v386_v42  ;;  %v342_v50 = vpack.c.bf16 %v3593_v48, %v3592_v39  ;;  %v188_v52 = vpop.f32.mrb[11].mxu0  ;;  %3637 = vmatmul.mubr.bf16.gmra.mrb[20].mxu0 %v363_v45 }
  0xfe   :  { %v373_v51 = vpack.c.bf16 %v3611_v49, %v3610_v40  ;;  %v309_v53 = vpop.f32.mrb[11].mxu1  ;;  %3669 = vmatmul.mubr.bf16.gmra.mrb[20].mxu1 %v387_v46  ;;  %v341_v54 = vpack.c.bf16 %v188_v52, %v185_v43  ;;  %3685 = vmatpush3.bf16.msra.mxu0 %v4207_v36 }
  0xff   :  { %v372_v55 = vpack.c.bf16 %v309_v53, %v306_v44  ;;  %3717 = vmatpush3.bf16.msra.mxu1 %v4207_v36  ;;  %v357_v56 = vadd.bf16 %v4470_v3, %v342_v50  ;;  %3686 = vmatprep.subr.bf16.mxu0 %v4208_v47  ;;  %v4509_v36 = vrot.slane %v4505_v31, %v4466_v62 }
 0x100   :  { %v381_v57 = vadd.bf16 %v373_v51, %v4470_v3  ;;  %3718 = vmatprep.subr.bf16.mxu1 %v4208_v47  ;;  %v356_v63 = vadd.bf16 %v4470_v3, %v341_v54 }
 0x101   :  { %v380_v0 = vadd.bf16 %v372_v55, %v4470_v3  ;;  %v365_v8 = vmax.bf16 %v4296_v18, %v357_v56  ;;  %v4214_v56 = vld [vmem:[#allocation2 + $0x88] sm:$0xff]  }
 0x102   :  { %v3596_v1 = vpop.f32.mrb[12].mxu0  ;;  %v364_v4 = vmax.bf16 %v4296_v18, %v356_v63  ;;  %3687 = vmatpush3.bf16.msra.mxu0 %v4208_v47  ;;  %v389_v9 = vmax.bf16 %v4296_v18, %v381_v57 }
 0x103   :  { %v3614_v2 = vpop.f32.mrb[12].mxu1  ;;  %v388_v5 = vmax.bf16 %v4296_v18, %v380_v0  ;;  %3719 = vmatpush3.bf16.msra.mxu1 %v4208_v47  ;;  %v201_v6 = vpop.f32.mrb[13].mxu0  ;;  %3688 = vmatprep.subr.bf16.mxu0 %v4209_v58 }
 0x104   :  { %v322_v7 = vpop.f32.mrb[13].mxu1  ;;  %3720 = vmatprep.subr.bf16.mxu1 %v4209_v58  ;;  %v3597_v11 = vpop.f32.mrb[14].mxu0  ;;  %3640 = vmatprep.mubr.bf16.mxu0 %v364_v4 }
 0x105   :  { %v3615_v12 = vpop.f32.mrb[14].mxu1  ;;  %3672 = vmatprep.mubr.bf16.mxu1 %v388_v5  ;;  %v344_v13 = vpack.c.bf16 %v3597_v11, %v3596_v1  ;;  %v204_v15 = vpop.f32.mrb[15].mxu0  ;;  %3641 = vmatmul.mubr.bf16.gmra.mrb[24].mxu0 %v365_v8  ;;  %v4215_v8 = vld [vmem:[#allocation2 + $0x90] sm:$0xff]  }
 0x106   :  { %v375_v14 = vpack.c.bf16 %v3615_v12, %v3614_v2  ;;  %v325_v16 = vpop.f32.mrb[15].mxu1  ;;  %3673 = vmatmul.mubr.bf16.gmra.mrb[24].mxu1 %v389_v9  ;;  %v343_v17 = vpack.c.bf16 %v204_v15, %v201_v6  ;;  %3689 = vmatpush3.bf16.msra.mxu0 %v4209_v58 }
 0x107   :  { %v374_v19 = vpack.c.bf16 %v325_v16, %v322_v7  ;;  %3721 = vmatpush3.bf16.msra.mxu1 %v4209_v58  ;;  %v359_v20 = vadd.bf16 %v4470_v3, %v344_v13  ;;  %3690 = vmatprep.subr.bf16.mxu0 %v4210_v10 }
 0x108   :  { %v383_v21 = vadd.bf16 %v375_v14, %v4470_v3  ;;  %3722 = vmatprep.subr.bf16.mxu1 %v4210_v10  ;;  %v358_v22 = vadd.bf16 %v4470_v3, %v343_v17 }
 0x109   :  { %v382_v23 = vadd.bf16 %v374_v19, %v4470_v3  ;;  %v367_v26 = vmax.bf16 %v4296_v18, %v359_v20  ;;  %v4212_v3 = vld [vmem:[#allocation2 + $0x78] sm:$0xff]  }
 0x10a   :  { %v366_v24 = vmax.bf16 %v4296_v18, %v358_v22  ;;  %3691 = vmatpush3.bf16.msra.mxu0 %v4210_v10  ;;  %v391_v27 = vmax.bf16 %v4296_v18, %v383_v21  ;;  %v4216_v20 = vld [vmem:[#allocation2 + $0x98] sm:$0xff]  }
 0x10b   :  { %v390_v25 = vmax.bf16 %v4296_v18, %v382_v23  ;;  %3723 = vmatpush3.bf16.msra.mxu1 %v4210_v10  ;;  %3692 = vmatprep.subr.bf16.mxu0 %v4211_v28 }
 0x10c   :  { %3644 = vmatprep.mubr.bf16.mxu0 %v366_v24  ;;  %3724 = vmatprep.subr.bf16.mxu1 %v4211_v28 }
 0x10d   :  { %3676 = vmatprep.mubr.bf16.mxu1 %v390_v25  ;;  %3645 = vmatmul.mubr.bf16.gmra.mrb[28].mxu0 %v367_v26 }
 0x10e   :  { %3677 = vmatmul.mubr.bf16.gmra.mrb[28].mxu1 %v391_v27  ;;  %3693 = vmatpush3.bf16.msra.mxu0 %v4211_v28 }
 0x10f   :  { %3725 = vmatpush3.bf16.msra.mxu1 %v4211_v28  ;;  %3694 = vmatprep.subr.bf16.mxu0 %v4212_v3 }
 0x110   :  { %3726 = vmatprep.subr.bf16.mxu1 %v4212_v3 }
 0x112   :  { %3695 = vmatpush3.bf16.msra.mxu0 %v4212_v3 }
 0x113   :  { %3727 = vmatpush3.bf16.msra.mxu1 %v4212_v3  ;;  %3744 = vmatprep.subr.bf16.mxu0 %v4213_v29 }
 0x114   :  { %3776 = vmatprep.subr.bf16.mxu1 %v4213_v29 }
 0x1c8   :  { %v3634_v32 = vpop.f32.mrb[16].mxu0 }
 0x1c9   :  { %v3666_v33 = vpop.f32.mrb[16].mxu1  ;;  %v490_v34 = vpop.f32.mrb[17].mxu0 }
 0x1ca   :  { %v587_v35 = vpop.f32.mrb[17].mxu1  ;;  %v3635_v37 = vpop.f32.mrb[18].mxu0 }
 0x1cb   :  { %v3667_v38 = vpop.f32.mrb[18].mxu1  ;;  %v651_v39 = vpack.c.bf16 %v3635_v37, %v3634_v32  ;;  %v493_v41 = vpop.f32.mrb[19].mxu0 }
 0x1cc   :  { %v682_v40 = vpack.c.bf16 %v3667_v38, %v3666_v33  ;;  %v590_v42 = vpop.f32.mrb[19].mxu1  ;;  %v650_v43 = vpack.c.bf16 %v493_v41, %v490_v34 }
 0x1cd   :  { %v681_v44 = vpack.c.bf16 %v590_v42, %v587_v35  ;;  %v666_v60 = vadd.bf16 %v4509_v36, %v651_v39 }
 0x1ce   :  { %v690_v45 = vadd.bf16 %v682_v40, %v4509_v36  ;;  %v665_v46 = vadd.bf16 %v4509_v36, %v650_v43  ;;  %v4218_v43 = vld [vmem:[#allocation2 + $0xa8] sm:$0xff]  }
 0x1cf   :  { %v689_v47 = vadd.bf16 %v681_v44, %v4509_v36  ;;  %v674_v52 = vmax.bf16 %v4296_v18, %v666_v60 }
 0x1d0   :  { %v3638_v48 = vpop.f32.mrb[20].mxu0  ;;  %v673_v50 = vmax.bf16 %v4296_v18, %v665_v46  ;;  %v698_v53 = vmax.bf16 %v4296_v18, %v690_v45 }
 0x1d1   :  { %v3670_v49 = vpop.f32.mrb[20].mxu1  ;;  %v697_v51 = vmax.bf16 %v4296_v18, %v689_v47  ;;  %v506_v54 = vpop.f32.mrb[21].mxu0 }
 0x1d2   :  { %v603_v55 = vpop.f32.mrb[21].mxu1  ;;  %v3639_v57 = vpop.f32.mrb[22].mxu0  ;;  %3696 = vmatprep.mubr.bf16.mxu0 %v673_v50 }
 0x1d3   :  { %v3671_v58 = vpop.f32.mrb[22].mxu1  ;;  %3728 = vmatprep.mubr.bf16.mxu1 %v697_v51  ;;  %v653_v63 = vpack.c.bf16 %v3639_v57, %v3638_v48  ;;  %v509_v1 = vpop.f32.mrb[23].mxu0  ;;  %3697 = vmatmul.mubr.bf16.vlgmr.msra.gmra.mrb[32].mxu0 %v674_v52 }
 0x1d4   :  { %v684_v0 = vpack.c.bf16 %v3671_v58, %v3670_v49  ;;  %v606_v2 = vpop.f32.mrb[23].mxu1  ;;  %3729 = vmatmul.mubr.bf16.vlgmr.msra.gmra.mrb[32].mxu1 %v698_v53  ;;  %v652_v4 = vpack.c.bf16 %v509_v1, %v506_v54  ;;  %3745 = vmatpush3.bf16.msra.mxu0 %v4213_v29  ;;  %v4544_v1 = vsub.s32 1, %v4454_v59 }
 0x1d5   :  { %v683_v5 = vpack.c.bf16 %v606_v2, %v603_v55  ;;  %3777 = vmatpush3.bf16.msra.mxu1 %v4213_v29  ;;  %v668_v6 = vadd.bf16 %v4509_v36, %v653_v63  ;;  %3746 = vmatprep.subr.bf16.mxu0 %v4214_v56  ;;  %v4219_v63 = vld [vmem:[#allocation2 + $0xb0] sm:$0xff]  }
 0x1d6   :  { %v692_v7 = vadd.bf16 %v684_v0, %v4509_v36  ;;  %3778 = vmatprep.subr.bf16.mxu1 %v4214_v56  ;;  %v667_v9 = vadd.bf16 %v4509_v36, %v652_v4  ;;  %v4221_v0 = vld [vmem:[#allocation2 + $0xc0] sm:$0xff]  }
 0x1d7   :  { %v691_v10 = vadd.bf16 %v683_v5, %v4509_v36  ;;  %v676_v17 = vmax.bf16 %v4296_v18, %v668_v6 }
 0x1d8   :  { %v3642_v11 = vpop.f32.mrb[24].mxu0  ;;  %v675_v13 = vmax.bf16 %v4296_v18, %v667_v9  ;;  %3747 = vmatpush3.bf16.msra.mxu0 %v4214_v56  ;;  %v700_v19 = vmax.bf16 %v4296_v18, %v692_v7  ;;  %v4548_v7 = vrot.slane %v4463_v61, %v4544_v1 }
 0x1d9   :  { %v3674_v12 = vpop.f32.mrb[24].mxu1  ;;  %v699_v14 = vmax.bf16 %v4296_v18, %v691_v10  ;;  %3779 = vmatpush3.bf16.msra.mxu1 %v4214_v56  ;;  %v522_v15 = vpop.f32.mrb[25].mxu0  ;;  %3748 = vmatprep.subr.bf16.mxu0 %v4215_v8 }
 0x1da   :  { %v619_v16 = vpop.f32.mrb[25].mxu1  ;;  %3780 = vmatprep.subr.bf16.mxu1 %v4215_v8  ;;  %v3643_v21 = vpop.f32.mrb[26].mxu0  ;;  %3700 = vmatprep.mubr.bf16.mxu0 %v675_v13 }
 0x1db   :  { %v3675_v22 = vpop.f32.mrb[26].mxu1  ;;  %3732 = vmatprep.mubr.bf16.mxu1 %v699_v14  ;;  %v655_v23 = vpack.c.bf16 %v3643_v21, %v3642_v11  ;;  %v525_v25 = vpop.f32.mrb[27].mxu0  ;;  %3701 = vmatmul.mubr.bf16.gmra.mrb[36].mxu0 %v676_v17 }
 0x1dc   :  { %v686_v24 = vpack.c.bf16 %v3675_v22, %v3674_v12  ;;  %v622_v26 = vpop.f32.mrb[27].mxu1  ;;  %3733 = vmatmul.mubr.bf16.gmra.mrb[36].mxu1 %v700_v19  ;;  %v654_v27 = vpack.c.bf16 %v525_v25, %v522_v15  ;;  %3749 = vmatpush3.bf16.msra.mxu0 %v4215_v8 }
 0x1dd   :  { %v685_v28 = vpack.c.bf16 %v622_v26, %v619_v16  ;;  %3781 = vmatpush3.bf16.msra.mxu1 %v4215_v8  ;;  %v670_v3 = vadd.bf16 %v4509_v36, %v655_v23  ;;  %3750 = vmatprep.subr.bf16.mxu0 %v4216_v20 }
 0x1de   :  { %v694_v29 = vadd.bf16 %v686_v24, %v4509_v36  ;;  %3782 = vmatprep.subr.bf16.mxu1 %v4216_v20  ;;  %v669_v32 = vadd.bf16 %v4509_v36, %v654_v27 }
 0x1df   :  { %v693_v33 = vadd.bf16 %v685_v28, %v4509_v36  ;;  %v678_v41 = vmax.bf16 %v4296_v18, %v670_v3  ;;  %v4222_v3 = vld [vmem:[#allocation2 + $0xc8] sm:$0xff]  }
 0x1e0   :  { %v3646_v34 = vpop.f32.mrb[28].mxu0  ;;  %v677_v37 = vmax.bf16 %v4296_v18, %v669_v32  ;;  %3751 = vmatpush3.bf16.msra.mxu0 %v4216_v20  ;;  %v702_v42 = vmax.bf16 %v4296_v18, %v694_v29 }
 0x1e1   :  { %v3678_v35 = vpop.f32.mrb[28].mxu1  ;;  %v701_v38 = vmax.bf16 %v4296_v18, %v693_v33  ;;  %3783 = vmatpush3.bf16.msra.mxu1 %v4216_v20  ;;  %v538_v39 = vpop.f32.mrb[29].mxu0  ;;  %3752 = vmatprep.subr.bf16.mxu0 %v4217_v30 }
 0x1e2   :  { %v635_v40 = vpop.f32.mrb[29].mxu1  ;;  %3784 = vmatprep.subr.bf16.mxu1 %v4217_v30  ;;  %v3647_v44 = vpop.f32.mrb[30].mxu0  ;;  %3704 = vmatprep.mubr.bf16.mxu0 %v677_v37 }
 0x1e3   :  { %v3679_v60 = vpop.f32.mrb[30].mxu1  ;;  %3736 = vmatprep.mubr.bf16.mxu1 %v701_v38  ;;  %v657_v45 = vpack.c.bf16 %v3647_v44, %v3646_v34  ;;  %v541_v47 = vpop.f32.mrb[31].mxu0  ;;  %3705 = vmatmul.mubr.bf16.gmra.mrb[40].mxu0 %v678_v41  ;;  %v4223_v41 = vld [vmem:[#allocation2 + $0xd0] sm:$0xff]  }
 0x1e4   :  { %v688_v46 = vpack.c.bf16 %v3679_v60, %v3678_v35  ;;  %v638_v48 = vpop.f32.mrb[31].mxu1  ;;  %3737 = vmatmul.mubr.bf16.gmra.mrb[40].mxu1 %v702_v42  ;;  %v656_v49 = vpack.c.bf16 %v541_v47, %v538_v39  ;;  %3753 = vmatpush3.bf16.msra.mxu0 %v4217_v30 }
 0x1e5   :  { %v687_v50 = vpack.c.bf16 %v638_v48, %v635_v40  ;;  %3785 = vmatpush3.bf16.msra.mxu1 %v4217_v30  ;;  %v672_v51 = vadd.bf16 %v4509_v36, %v657_v45  ;;  %3754 = vmatprep.subr.bf16.mxu0 %v4218_v43 }
 0x1e6   :  { %v696_v52 = vadd.bf16 %v688_v46, %v4509_v36  ;;  %3786 = vmatprep.subr.bf16.mxu1 %v4218_v43  ;;  %v671_v53 = vadd.bf16 %v4509_v36, %v656_v49 }
 0x1e7   :  { %v695_v54 = vadd.bf16 %v687_v50, %v4509_v36  ;;  %v680_v57 = vmax.bf16 %v4296_v18, %v672_v51  ;;  %v4220_v36 = vld [vmem:[#allocation2 + $0xb8] sm:$0xff]  }
 0x1e8   :  { %v679_v55 = vmax.bf16 %v4296_v18, %v671_v53  ;;  %3755 = vmatpush3.bf16.msra.mxu0 %v4218_v43  ;;  %v704_v58 = vmax.bf16 %v4296_v18, %v696_v52  ;;  %v4224_v51 = vld [vmem:[#allocation2 + $0xd8] sm:$0xff]  }
 0x1e9   :  { %v703_v56 = vmax.bf16 %v4296_v18, %v695_v54  ;;  %3787 = vmatpush3.bf16.msra.mxu1 %v4218_v43  ;;  %3756 = vmatprep.subr.bf16.mxu0 %v4219_v63 }
 0x1ea   :  { %3708 = vmatprep.mubr.bf16.mxu0 %v679_v55  ;;  %3788 = vmatprep.subr.bf16.mxu1 %v4219_v63 }
 0x1eb   :  { %3740 = vmatprep.mubr.bf16.mxu1 %v703_v56  ;;  %3709 = vmatmul.mubr.bf16.gmra.mrb[44].mxu0 %v680_v57 }
 0x1ec   :  { %3741 = vmatmul.mubr.bf16.gmra.mrb[44].mxu1 %v704_v58  ;;  %3757 = vmatpush3.bf16.msra.mxu0 %v4219_v63 }
 0x1ed   :  { %3789 = vmatpush3.bf16.msra.mxu1 %v4219_v63  ;;  %3758 = vmatprep.subr.bf16.mxu0 %v4220_v36 }
 0x1ee   :  { %3790 = vmatprep.subr.bf16.mxu1 %v4220_v36 }
 0x1f0   :  { %3759 = vmatpush3.bf16.msra.mxu0 %v4220_v36 }
 0x1f1   :  { %3791 = vmatpush3.bf16.msra.mxu1 %v4220_v36  ;;  %3808 = vmatprep.subr.bf16.mxu0 %v4221_v0 }
 0x1f2   :  { %3840 = vmatprep.subr.bf16.mxu1 %v4221_v0 }
 0x2a6   :  { %v3698_v2 = vpop.f32.mrb[32].mxu0 }
 0x2a7   :  { %v3730_v4 = vpop.f32.mrb[32].mxu1  ;;  %v804_v5 = vpop.f32.mrb[33].mxu0 }
 0x2a8   :  { %v901_v6 = vpop.f32.mrb[33].mxu1  ;;  %v3699_v8 = vpop.f32.mrb[34].mxu0 }
 0x2a9   :  { %v3731_v9 = vpop.f32.mrb[34].mxu1  ;;  %v965_v10 = vpack.c.bf16 %v3699_v8, %v3698_v2  ;;  %v807_v12 = vpop.f32.mrb[35].mxu0  ;;  %v4225_v2 = vld [vmem:[#allocation2 + $0xe0] sm:$0xff]  }
 0x2aa   :  { %v993_v11 = vpack.c.bf16 %v3731_v9, %v3730_v4  ;;  %v904_v13 = vpop.f32.mrb[35].mxu1  ;;  %v964_v14 = vpack.c.bf16 %v807_v12, %v804_v5 }
 0x2ab   :  { %v992_v15 = vpack.c.bf16 %v904_v13, %v901_v6  ;;  %v977_v16 = vadd.bf16 %v4548_v7, %v965_v10 }
 0x2ac   :  { %v1001_v17 = vadd.bf16 %v993_v11, %v4548_v7  ;;  %v976_v19 = vadd.bf16 %v4548_v7, %v964_v14 }
 0x2ad   :  { %v1000_v20 = vadd.bf16 %v992_v15, %v4548_v7  ;;  %v985_v25 = vmax.bf16 %v4296_v18, %v977_v16  ;;  %v4226_v15 = vld [vmem:[#allocation2 + $0xe8] sm:$0xff]  }
 0x2ae   :  { %v3702_v21 = vpop.f32.mrb[36].mxu0  ;;  %v984_v23 = vmax.bf16 %v4296_v18, %v976_v19  ;;  %v1009_v26 = vmax.bf16 %v4296_v18, %v1001_v17 }
 0x2af   :  { %v3734_v22 = vpop.f32.mrb[36].mxu1  ;;  %v1008_v24 = vmax.bf16 %v4296_v18, %v1000_v20  ;;  %v820_v27 = vpop.f32.mrb[37].mxu0 }
 0x2b0   :  { %v917_v28 = vpop.f32.mrb[37].mxu1  ;;  %v3703_v29 = vpop.f32.mrb[38].mxu0  ;;  %3760 = vmatprep.mubr.bf16.mxu0 %v984_v23 }
 0x2b1   :  { %v3735_v30 = vpop.f32.mrb[38].mxu1  ;;  %3792 = vmatprep.mubr.bf16.mxu1 %v1008_v24  ;;  %v967_v32 = vpack.c.bf16 %v3703_v29, %v3702_v21  ;;  %v823_v34 = vpop.f32.mrb[39].mxu0  ;;  %3761 = vmatmul.mubr.bf16.vlgmr.msra.gmra.mrb[48].mxu0 %v985_v25 }
 0x2b2   :  { %v995_v33 = vpack.c.bf16 %v3735_v30, %v3734_v22  ;;  %v920_v35 = vpop.f32.mrb[39].mxu1  ;;  %3793 = vmatmul.mubr.bf16.vlgmr.msra.gmra.mrb[48].mxu1 %v1009_v26  ;;  %v966_v37 = vpack.c.bf16 %v823_v34, %v820_v27  ;;  %3809 = vmatpush3.bf16.msra.mxu0 %v4221_v0  ;;  %v4229_v34 = vld [vmem:[#allocation2 + $0x100] sm:$0xff]  }
 0x2b3   :  { %v994_v38 = vpack.c.bf16 %v920_v35, %v917_v28  ;;  %3841 = vmatpush3.bf16.msra.mxu1 %v4221_v0  ;;  %v979_v39 = vadd.bf16 %v4548_v7, %v967_v32  ;;  %3810 = vmatprep.subr.bf16.mxu0 %v4222_v3 }
 0x2b4   :  { %v1003_v40 = vadd.bf16 %v995_v33, %v4548_v7  ;;  %3842 = vmatprep.subr.bf16.mxu1 %v4222_v3  ;;  %v978_v42 = vadd.bf16 %v4548_v7, %v966_v37  ;;  %v4227_v33 = vld [vmem:[#allocation2 + $0xf0] sm:$0xff]  }
 0x2b5   :  { %v1002_v43 = vadd.bf16 %v994_v38, %v4548_v7  ;;  %v987_v49 = vmax.bf16 %v4296_v18, %v979_v39 }
 0x2b6   :  { %v3706_v44 = vpop.f32.mrb[40].mxu0  ;;  %v986_v45 = vmax.bf16 %v4296_v18, %v978_v42  ;;  %3811 = vmatpush3.bf16.msra.mxu0 %v4222_v3  ;;  %v1011_v50 = vmax.bf16 %v4296_v18, %v1003_v40  ;;  %v4584_v40 = vrot.slane %v4505_v31, %v4544_v1 }
 0x2b7   :  { %v3738_v60 = vpop.f32.mrb[40].mxu1  ;;  %v1010_v46 = vmax.bf16 %v4296_v18, %v1002_v43  ;;  %3843 = vmatpush3.bf16.msra.mxu1 %v4222_v3  ;;  %v836_v47 = vpop.f32.mrb[41].mxu0  ;;  %3812 = vmatprep.subr.bf16.mxu0 %v4223_v41 }
 0x2b8   :  { %v933_v48 = vpop.f32.mrb[41].mxu1  ;;  %3844 = vmatprep.subr.bf16.mxu1 %v4223_v41  ;;  %v3707_v52 = vpop.f32.mrb[42].mxu0  ;;  %3764 = vmatprep.mubr.bf16.mxu0 %v986_v45 }
 0x2b9   :  { %v3739_v53 = vpop.f32.mrb[42].mxu1  ;;  %3796 = vmatprep.mubr.bf16.mxu1 %v1010_v46  ;;  %v969_v54 = vpack.c.bf16 %v3707_v52, %v3706_v44  ;;  %v839_v56 = vpop.f32.mrb[43].mxu0  ;;  %3765 = vmatmul.mubr.bf16.gmra.mrb[52].mxu0 %v987_v49 }
 0x2ba   :  { %v997_v55 = vpack.c.bf16 %v3739_v53, %v3738_v60  ;;  %v936_v57 = vpop.f32.mrb[43].mxu1  ;;  %3797 = vmatmul.mubr.bf16.gmra.mrb[52].mxu1 %v1011_v50  ;;  %v968_v58 = vpack.c.bf16 %v839_v56, %v836_v47  ;;  %3813 = vmatpush3.bf16.msra.mxu0 %v4223_v41 }
 0x2bb   :  { %v996_v63 = vpack.c.bf16 %v936_v57, %v933_v48  ;;  %3845 = vmatpush3.bf16.msra.mxu1 %v4223_v41  ;;  %v981_v36 = vadd.bf16 %v4548_v7, %v969_v54  ;;  %3814 = vmatprep.subr.bf16.mxu0 %v4224_v51 }
 0x2bc   :  { %v1005_v0 = vadd.bf16 %v997_v55, %v4548_v7  ;;  %3846 = vmatprep.subr.bf16.mxu1 %v4224_v51  ;;  %v980_v4 = vadd.bf16 %v4548_v7, %v968_v58 }
 0x2bd   :  { %v1004_v5 = vadd.bf16 %v996_v63, %v4548_v7  ;;  %v989_v13 = vmax.bf16 %v4296_v18, %v981_v36  ;;  %v4230_v36 = vld [vmem:[#allocation2 + $0x108] sm:$0xff]  }
 0x2be   :  { %v3710_v6 = vpop.f32.mrb[44].mxu0  ;;  %v988_v9 = vmax.bf16 %v4296_v18, %v980_v4  ;;  %3815 = vmatpush3.bf16.msra.mxu0 %v4224_v51  ;;  %v1013_v14 = vmax.bf16 %v4296_v18, %v1005_v0 }
 0x2bf   :  { %v3742_v8 = vpop.f32.mrb[44].mxu1  ;;  %v1012_v10 = vmax.bf16 %v4296_v18, %v1004_v5  ;;  %3847 = vmatpush3.bf16.msra.mxu1 %v4224_v51  ;;  %v852_v11 = vpop.f32.mrb[45].mxu0  ;;  %3816 = vmatprep.subr.bf16.mxu0 %v4225_v2 }
 0x2c0   :  { %v949_v12 = vpop.f32.mrb[45].mxu1  ;;  %3848 = vmatprep.subr.bf16.mxu1 %v4225_v2  ;;  %v3711_v16 = vpop.f32.mrb[46].mxu0  ;;  %3768 = vmatprep.mubr.bf16.mxu0 %v988_v9 }
 0x2c1   :  { %v3743_v17 = vpop.f32.mrb[46].mxu1  ;;  %3800 = vmatprep.mubr.bf16.mxu1 %v1012_v10  ;;  %v971_v19 = vpack.c.bf16 %v3711_v16, %v3710_v6  ;;  %v855_v21 = vpop.f32.mrb[47].mxu0  ;;  %3769 = vmatmul.mubr.bf16.gmra.mrb[56].mxu0 %v989_v13  ;;  %v4231_v13 = vld [vmem:[#allocation2 + $0x110] sm:$0xff]  }
 0x2c2   :  { %v999_v20 = vpack.c.bf16 %v3743_v17, %v3742_v8  ;;  %v952_v22 = vpop.f32.mrb[47].mxu1  ;;  %3801 = vmatmul.mubr.bf16.gmra.mrb[56].mxu1 %v1013_v14  ;;  %v970_v23 = vpack.c.bf16 %v855_v21, %v852_v11  ;;  %3817 = vmatpush3.bf16.msra.mxu0 %v4225_v2 }
 0x2c3   :  { %v998_v24 = vpack.c.bf16 %v952_v22, %v949_v12  ;;  %3849 = vmatpush3.bf16.msra.mxu1 %v4225_v2  ;;  %v983_v25 = vadd.bf16 %v4548_v7, %v971_v19  ;;  %3818 = vmatprep.subr.bf16.mxu0 %v4226_v15 }
 0x2c4   :  { %v1007_v26 = vadd.bf16 %v999_v20, %v4548_v7  ;;  %3850 = vmatprep.subr.bf16.mxu1 %v4226_v15  ;;  %v982_v27 = vadd.bf16 %v4548_v7, %v970_v23 }
 0x2c5   :  { %v1006_v28 = vadd.bf16 %v998_v24, %v4548_v7  ;;  %v991_v30 = vmax.bf16 %v4296_v18, %v983_v25  ;;  %v4228_v7 = vld [vmem:[#allocation2 + $0xf8] sm:$0xff]  }
 0x2c6   :  { %v990_v3 = vmax.bf16 %v4296_v18, %v982_v27  ;;  %3819 = vmatpush3.bf16.msra.mxu0 %v4226_v15  ;;  %v1015_v32 = vmax.bf16 %v4296_v18, %v1007_v26  ;;  %v4232_v25 = vld [vmem:[#allocation2 + $0x118] sm:$0xff]  }
 0x2c7   :  { %v1014_v29 = vmax.bf16 %v4296_v18, %v1006_v28  ;;  %3851 = vmatpush3.bf16.msra.mxu1 %v4226_v15  ;;  %3820 = vmatprep.subr.bf16.mxu0 %v4227_v33 }
 0x2c8   :  { %3772 = vmatprep.mubr.bf16.mxu0 %v990_v3  ;;  %3852 = vmatprep.subr.bf16.mxu1 %v4227_v33 }
 0x2c9   :  { %3804 = vmatprep.mubr.bf16.mxu1 %v1014_v29  ;;  %3773 = vmatmul.mubr.bf16.gmra.mrb[60].mxu0 %v991_v30 }
 0x2ca   :  { %3805 = vmatmul.mubr.bf16.gmra.mrb[60].mxu1 %v1015_v32  ;;  %3821 = vmatpush3.bf16.msra.mxu0 %v4227_v33 }
 0x2cb   :  { %3853 = vmatpush3.bf16.msra.mxu1 %v4227_v33  ;;  %3822 = vmatprep.subr.bf16.mxu0 %v4228_v7 }
 0x2cc   :  { %3854 = vmatprep.subr.bf16.mxu1 %v4228_v7 }
 0x2ce   :  { %3823 = vmatpush3.bf16.msra.mxu0 %v4228_v7 }
 0x2cf   :  { %3855 = vmatpush3.bf16.msra.mxu1 %v4228_v7  ;;  %3872 = vmatprep.subr.bf16.mxu0 %v4229_v34 }
 0x2d0   :  { %3904 = vmatprep.subr.bf16.mxu1 %v4229_v34 }
 0x384   :  { %v3762_v35 = vpop.f32.mrb[48].mxu0 }
 0x385   :  { %v3794_v37 = vpop.f32.mrb[48].mxu1  ;;  %v1115_v38 = vpop.f32.mrb[49].mxu0 }
 0x386   :  { %v1212_v39 = vpop.f32.mrb[49].mxu1  ;;  %v3763_v41 = vpop.f32.mrb[50].mxu0 }
 0x387   :  { %v3795_v42 = vpop.f32.mrb[50].mxu1  ;;  %v1276_v43 = vpack.c.bf16 %v3763_v41, %v3762_v35  ;;  %v1118_v60 = vpop.f32.mrb[51].mxu0  ;;  %v4233_v35 = vld [vmem:[#allocation2 + $0x120] sm:$0xff]  }
 0x388   :  { %v1304_v44 = vpack.c.bf16 %v3795_v42, %v3794_v37  ;;  %v1215_v45 = vpop.f32.mrb[51].mxu1  ;;  %v1275_v46 = vpack.c.bf16 %v1118_v60, %v1115_v38 }
 0x389   :  { %v1303_v47 = vpack.c.bf16 %v1215_v45, %v1212_v39  ;;  %v1288_v48 = vadd.bf16 %v4584_v40, %v1276_v43 }
 0x38a   :  { %v1312_v49 = vadd.bf16 %v1304_v44, %v4584_v40  ;;  %v1287_v50 = vadd.bf16 %v4584_v40, %v1275_v46 }
 0x38b   :  { %v1311_v51 = vadd.bf16 %v1303_v47, %v4584_v40  ;;  %v1296_v56 = vmax.bf16 %v4296_v18, %v1288_v48  ;;  %v4234_v47 = vld [vmem:[#allocation2 + $0x128] sm:$0xff]  }
 0x38c   :  { %v3766_v52 = vpop.f32.mrb[52].mxu0  ;;  %v1295_v54 = vmax.bf16 %v4296_v18, %v1287_v50  ;;  %v1320_v57 = vmax.bf16 %v4296_v18, %v1312_v49 }
 0x38d   :  { %v3798_v53 = vpop.f32.mrb[52].mxu1  ;;  %v1319_v55 = vmax.bf16 %v4296_v18, %v1311_v51  ;;  %v1131_v58 = vpop.f32.mrb[53].mxu0 }
 0x38e   :  { %v1228_v63 = vpop.f32.mrb[53].mxu1  ;;  %v3767_v0 = vpop.f32.mrb[54].mxu0  ;;  %3824 = vmatprep.mubr.bf16.mxu0 %v1295_v54 }
 0x38f   :  { %v3799_v2 = vpop.f32.mrb[54].mxu1  ;;  %3856 = vmatprep.mubr.bf16.mxu1 %v1319_v55  ;;  %v1278_v4 = vpack.c.bf16 %v3767_v0, %v3766_v52  ;;  %v1134_v6 = vpop.f32.mrb[55].mxu0  ;;  %3825 = vmatmul.mubr.bf16.vlgmr.msra.gmra.mrb[64].mxu0 %v1296_v56 }
 0x390   :  { %v1306_v5 = vpack.c.bf16 %v3799_v2, %v3798_v53  ;;  %v1231_v8 = vpop.f32.mrb[55].mxu1  ;;  %3857 = vmatmul.mubr.bf16.vlgmr.msra.gmra.mrb[64].mxu1 %v1320_v57  ;;  %v1277_v9 = vpack.c.bf16 %v1134_v6, %v1131_v58  ;;  %3873 = vmatpush3.bf16.msra.mxu0 %v4229_v34  ;;  %v4237_v6 = vld [vmem:[#allocation2 + $0x140] sm:$0xff]  }
 0x391   :  { %v1305_v10 = vpack.c.bf16 %v1231_v8, %v1228_v63  ;;  %3905 = vmatpush3.bf16.msra.mxu1 %v4229_v34  ;;  %v1290_v11 = vadd.bf16 %v4584_v40, %v1278_v4  ;;  %3874 = vmatprep.subr.bf16.mxu0 %v4230_v36  ;;  %v1596_v8 = vsub.s32 2, %v4454_v59 }
 0x392   :  { %v1314_v12 = vadd.bf16 %v1306_v5, %v4584_v40  ;;  %3906 = vmatprep.subr.bf16.mxu1 %v4230_v36  ;;  %v1289_v14 = vadd.bf16 %v4584_v40, %v1277_v9  ;;  %v4235_v5 = vld [vmem:[#allocation2 + $0x130] sm:$0xff]  }
 0x393   :  { %v1313_v15 = vadd.bf16 %v1305_v10, %v4584_v40  ;;  %v1298_v23 = vmax.bf16 %v4296_v18, %v1290_v11 }
 0x394   :  { %v3770_v16 = vpop.f32.mrb[56].mxu0  ;;  %v1297_v19 = vmax.bf16 %v4296_v18, %v1289_v14  ;;  %3875 = vmatpush3.bf16.msra.mxu0 %v4230_v36  ;;  %v1322_v24 = vmax.bf16 %v4296_v18, %v1314_v12 }
 0x395   :  { %v3802_v17 = vpop.f32.mrb[56].mxu1  ;;  %v1321_v20 = vmax.bf16 %v4296_v18, %v1313_v15  ;;  %3907 = vmatpush3.bf16.msra.mxu1 %v4230_v36  ;;  %v1147_v21 = vpop.f32.mrb[57].mxu0  ;;  %3876 = vmatprep.subr.bf16.mxu0 %v4231_v13 }
 0x396   :  { %v1244_v22 = vpop.f32.mrb[57].mxu1  ;;  %3908 = vmatprep.subr.bf16.mxu1 %v4231_v13  ;;  %v3771_v26 = vpop.f32.mrb[58].mxu0  ;;  %3828 = vmatprep.mubr.bf16.mxu0 %v1297_v19 }
 0x397   :  { %v3803_v27 = vpop.f32.mrb[58].mxu1  ;;  %3860 = vmatprep.mubr.bf16.mxu1 %v1321_v20  ;;  %v1280_v28 = vpack.c.bf16 %v3771_v26, %v3770_v16  ;;  %v1150_v29 = vpop.f32.mrb[59].mxu0  ;;  %3829 = vmatmul.mubr.bf16.gmra.mrb[68].mxu0 %v1298_v23 }
 0x398   :  { %v1308_v3 = vpack.c.bf16 %v3803_v27, %v3802_v17  ;;  %v1247_v30 = vpop.f32.mrb[59].mxu1  ;;  %3861 = vmatmul.mubr.bf16.gmra.mrb[68].mxu1 %v1322_v24  ;;  %v1279_v32 = vpack.c.bf16 %v1150_v29, %v1147_v21  ;;  %3877 = vmatpush3.bf16.msra.mxu0 %v4231_v13 }
 0x399   :  { %v1307_v33 = vpack.c.bf16 %v1247_v30, %v1244_v22  ;;  %3909 = vmatpush3.bf16.msra.mxu1 %v4231_v13  ;;  %v1292_v7 = vadd.bf16 %v4584_v40, %v1280_v28  ;;  %3878 = vmatprep.subr.bf16.mxu0 %v4232_v25  ;;  %v4622_v13 = vrot.slane %v4463_v61, %v1596_v8 }
 0x39a   :  { %v1316_v34 = vadd.bf16 %v1308_v3, %v4584_v40  ;;  %3910 = vmatprep.subr.bf16.mxu1 %v4232_v25  ;;  %v1291_v37 = vadd.bf16 %v4584_v40, %v1279_v32 }
 0x39b   :  { %v1315_v38 = vadd.bf16 %v1307_v33, %v4584_v40  ;;  %v1300_v45 = vmax.bf16 %v4296_v18, %v1292_v7 }
 0x39c   :  { %v3774_v39 = vpop.f32.mrb[60].mxu0  ;;  %v1299_v42 = vmax.bf16 %v4296_v18, %v1291_v37  ;;  %3879 = vmatpush3.bf16.msra.mxu0 %v4232_v25  ;;  %v1324_v46 = vmax.bf16 %v4296_v18, %v1316_v34  ;;  %v4238_v34 = vld [vmem:[#allocation2 + $0x148] sm:$0xff]  }
 0x39d   :  { %v3806_v41 = vpop.f32.mrb[60].mxu1  ;;  %v1323_v43 = vmax.bf16 %v4296_v18, %v1315_v38  ;;  %3911 = vmatpush3.bf16.msra.mxu1 %v4232_v25  ;;  %v1163_v44 = vpop.f32.mrb[61].mxu0  ;;  %3880 = vmatprep.subr.bf16.mxu0 %v4233_v35 }
 0x39e   :  { %v1260_v60 = vpop.f32.mrb[61].mxu1  ;;  %3912 = vmatprep.subr.bf16.mxu1 %v4233_v35  ;;  %v3775_v48 = vpop.f32.mrb[62].mxu0  ;;  %3832 = vmatprep.mubr.bf16.mxu0 %v1299_v42 }
 0x39f   :  { %v3807_v49 = vpop.f32.mrb[62].mxu1  ;;  %3864 = vmatprep.mubr.bf16.mxu1 %v1323_v43  ;;  %v1282_v50 = vpack.c.bf16 %v3775_v48, %v3774_v39  ;;  %v1166_v52 = vpop.f32.mrb[63].mxu0  ;;  %3833 = vmatmul.mubr.bf16.gmra.mrb[72].mxu0 %v1300_v45 }
 0x3a0   :  { %v1310_v51 = vpack.c.bf16 %v3807_v49, %v3806_v41  ;;  %v1263_v53 = vpop.f32.mrb[63].mxu1  ;;  %3865 = vmatmul.mubr.bf16.gmra.mrb[72].mxu1 %v1324_v46  ;;  %v1281_v54 = vpack.c.bf16 %v1166_v52, %v1163_v44  ;;  %3881 = vmatpush3.bf16.msra.mxu0 %v4233_v35  ;;  %v4239_v46 = vld [vmem:[#allocation2 + $0x150] sm:$0xff]  }
 0x3a1   :  { %v1309_v55 = vpack.c.bf16 %v1263_v53, %v1260_v60  ;;  %3913 = vmatpush3.bf16.msra.mxu1 %v4233_v35  ;;  %v1294_v56 = vadd.bf16 %v4584_v40, %v1282_v50  ;;  %3882 = vmatprep.subr.bf16.mxu0 %v4234_v47 }
 0x3a2   :  { %v1318_v57 = vadd.bf16 %v1310_v51, %v4584_v40  ;;  %3914 = vmatprep.subr.bf16.mxu1 %v4234_v47  ;;  %v1293_v58 = vadd.bf16 %v4584_v40, %v1281_v54 }
 0x3a3   :  { %v1317_v63 = vadd.bf16 %v1309_v55, %v4584_v40  ;;  %v1302_v2 = vmax.bf16 %v4296_v18, %v1294_v56  ;;  %v4236_v40 = vld [vmem:[#allocation2 + $0x138] sm:$0xff]  }
 0x3a4   :  { %v1301_v36 = vmax.bf16 %v4296_v18, %v1293_v58  ;;  %3883 = vmatpush3.bf16.msra.mxu0 %v4234_v47  ;;  %v1326_v4 = vmax.bf16 %v4296_v18, %v1318_v57  ;;  %v4240_v57 = vld [vmem:[#allocation2 + $0x158] sm:$0xff]  }
 0x3a5   :  { %v1325_v0 = vmax.bf16 %v4296_v18, %v1317_v63  ;;  %3915 = vmatpush3.bf16.msra.mxu1 %v4234_v47  ;;  %3884 = vmatprep.subr.bf16.mxu0 %v4235_v5 }
 0x3a6   :  { %3836 = vmatprep.mubr.bf16.mxu0 %v1301_v36  ;;  %3916 = vmatprep.subr.bf16.mxu1 %v4235_v5 }
 0x3a7   :  { %3868 = vmatprep.mubr.bf16.mxu1 %v1325_v0  ;;  %3837 = vmatmul.mubr.bf16.gmra.mrb[76].mxu0 %v1302_v2 }
 0x3a8   :  { %3869 = vmatmul.mubr.bf16.gmra.mrb[76].mxu1 %v1326_v4  ;;  %3885 = vmatpush3.bf16.msra.mxu0 %v4235_v5 }
 0x3a9   :  { %3917 = vmatpush3.bf16.msra.mxu1 %v4235_v5  ;;  %3886 = vmatprep.subr.bf16.mxu0 %v4236_v40 }
 0x3aa   :  { %3918 = vmatprep.subr.bf16.mxu1 %v4236_v40 }
 0x3ac   :  { %3887 = vmatpush3.bf16.msra.mxu0 %v4236_v40 }
 0x3ad   :  { %3919 = vmatpush3.bf16.msra.mxu1 %v4236_v40  ;;  %3936 = vmatprep.subr.bf16.mxu0 %v4237_v6 }
 0x3ae   :  { %3968 = vmatprep.subr.bf16.mxu1 %v4237_v6 }
 0x462   :  { %v3826_v9 = vpop.f32.mrb[64].mxu0 }
 0x463   :  { %v3858_v10 = vpop.f32.mrb[64].mxu1  ;;  %v1426_v11 = vpop.f32.mrb[65].mxu0 }
 0x464   :  { %v1523_v12 = vpop.f32.mrb[65].mxu1  ;;  %v3827_v14 = vpop.f32.mrb[66].mxu0 }
 0x465   :  { %v3859_v15 = vpop.f32.mrb[66].mxu1  ;;  %v1587_v16 = vpack.c.bf16 %v3827_v14, %v3826_v9  ;;  %v1429_v19 = vpop.f32.mrb[67].mxu0 }
 0x466   :  { %v1615_v17 = vpack.c.bf16 %v3859_v15, %v3858_v10  ;;  %v1526_v20 = vpop.f32.mrb[67].mxu1  ;;  %v1586_v21 = vpack.c.bf16 %v1429_v19, %v1426_v11  ;;  %v4241_v10 = vld [vmem:[#allocation2 + $0x160] sm:$0xff]  }
 0x467   :  { %v1614_v22 = vpack.c.bf16 %v1526_v20, %v1523_v12  ;;  %v1599_v23 = vadd.bf16 %v4622_v13, %v1587_v16 }
 0x468   :  { %v1623_v24 = vadd.bf16 %v1615_v17, %v4622_v13  ;;  %v1598_v25 = vadd.bf16 %v4622_v13, %v1586_v21 }
 0x469   :  { %v1622_v26 = vadd.bf16 %v1614_v22, %v4622_v13  ;;  %v1607_v30 = vmax.bf16 %v4296_v18, %v1599_v23  ;;  %v4242_v23 = vld [vmem:[#allocation2 + $0x168] sm:$0xff]  }
 0x46a   :  { %v3830_v27 = vpop.f32.mrb[68].mxu0  ;;  %v1606_v3 = vmax.bf16 %v4296_v18, %v1598_v25  ;;  %v1631_v32 = vmax.bf16 %v4296_v18, %v1623_v24 }
 0x46b   :  { %v3862_v28 = vpop.f32.mrb[68].mxu1  ;;  %v1630_v29 = vmax.bf16 %v4296_v18, %v1622_v26  ;;  %v1442_v33 = vpop.f32.mrb[69].mxu0 }
 0x46c   :  { %v1539_v7 = vpop.f32.mrb[69].mxu1  ;;  %v3831_v35 = vpop.f32.mrb[70].mxu0  ;;  %3888 = vmatprep.mubr.bf16.mxu0 %v1606_v3 }
 0x46d   :  { %v3863_v37 = vpop.f32.mrb[70].mxu1  ;;  %3920 = vmatprep.mubr.bf16.mxu1 %v1630_v29  ;;  %v1589_v38 = vpack.c.bf16 %v3831_v35, %v3830_v27  ;;  %v1445_v41 = vpop.f32.mrb[71].mxu0  ;;  %3889 = vmatmul.mubr.bf16.vlgmr.msra.gmra.mrb[80].mxu0 %v1607_v30 }
 0x46e   :  { %v1617_v39 = vpack.c.bf16 %v3863_v37, %v3862_v28  ;;  %v1542_v42 = vpop.f32.mrb[71].mxu1  ;;  %3921 = vmatmul.mubr.bf16.vlgmr.msra.gmra.mrb[80].mxu1 %v1631_v32  ;;  %v1588_v43 = vpack.c.bf16 %v1445_v41, %v1442_v33  ;;  %3937 = vmatpush3.bf16.msra.mxu0 %v4237_v6  ;;  %v4243_v41 = vld [vmem:[#allocation2 + $0x170] sm:$0xff]  }
 0x46f   :  { %v1616_v44 = vpack.c.bf16 %v1542_v42, %v1539_v7  ;;  %3969 = vmatpush3.bf16.msra.mxu1 %v4237_v6  ;;  %v1601_v60 = vadd.bf16 %v4622_v13, %v1589_v38  ;;  %3938 = vmatprep.subr.bf16.mxu0 %v4238_v34  ;;  %v4245_v42 = vld [vmem:[#allocation2 + $0x180] sm:$0xff]  }
 0x470   :  { %v1625_v45 = vadd.bf16 %v1617_v39, %v4622_v13  ;;  %3970 = vmatprep.subr.bf16.mxu1 %v4238_v34  ;;  %v1600_v47 = vadd.bf16 %v4622_v13, %v1588_v43 }
 0x471   :  { %v1624_v48 = vadd.bf16 %v1616_v44, %v4622_v13  ;;  %v1609_v55 = vmax.bf16 %v4296_v18, %v1601_v60 }
 0x472   :  { %v3834_v49 = vpop.f32.mrb[72].mxu0  ;;  %v1608_v51 = vmax.bf16 %v4296_v18, %v1600_v47  ;;  %3939 = vmatpush3.bf16.msra.mxu0 %v4238_v34  ;;  %v1633_v56 = vmax.bf16 %v4296_v18, %v1625_v45 }
 0x473   :  { %v3866_v50 = vpop.f32.mrb[72].mxu1  ;;  %v1632_v52 = vmax.bf16 %v4296_v18, %v1624_v48  ;;  %3971 = vmatpush3.bf16.msra.mxu1 %v4238_v34  ;;  %v1458_v53 = vpop.f32.mrb[73].mxu0  ;;  %3940 = vmatprep.subr.bf16.mxu0 %v4239_v46 }
 0x474   :  { %v1555_v54 = vpop.f32.mrb[73].mxu1  ;;  %3972 = vmatprep.subr.bf16.mxu1 %v4239_v46  ;;  %v3835_v58 = vpop.f32.mrb[74].mxu0  ;;  %3892 = vmatprep.mubr.bf16.mxu0 %v1608_v51 }
 0x475   :  { %v3867_v63 = vpop.f32.mrb[74].mxu1  ;;  %3924 = vmatprep.mubr.bf16.mxu1 %v1632_v52  ;;  %v1591_v36 = vpack.c.bf16 %v3835_v58, %v3834_v49  ;;  %v1461_v2 = vpop.f32.mrb[75].mxu0  ;;  %3893 = vmatmul.mubr.bf16.gmra.mrb[84].mxu0 %v1609_v55 }
 0x476   :  { %v1619_v0 = vpack.c.bf16 %v3867_v63, %v3866_v50  ;;  %v1558_v4 = vpop.f32.mrb[75].mxu1  ;;  %3925 = vmatmul.mubr.bf16.gmra.mrb[84].mxu1 %v1633_v56  ;;  %v1590_v5 = vpack.c.bf16 %v1461_v2, %v1458_v53  ;;  %3941 = vmatpush3.bf16.msra.mxu0 %v4239_v46 }
 0x477   :  { %v1618_v40 = vpack.c.bf16 %v1558_v4, %v1555_v54  ;;  %3973 = vmatpush3.bf16.msra.mxu1 %v4239_v46  ;;  %v1603_v6 = vadd.bf16 %v4622_v13, %v1591_v36  ;;  %3942 = vmatprep.subr.bf16.mxu0 %v4240_v57  ;;  %v4659_v46 = vrot.slane %v4505_v31, %v1596_v8 }
 0x478   :  { %v1627_v9 = vadd.bf16 %v1619_v0, %v4622_v13  ;;  %3974 = vmatprep.subr.bf16.mxu1 %v4240_v57  ;;  %v1602_v11 = vadd.bf16 %v4622_v13, %v1590_v5 }
 0x479   :  { %v1626_v12 = vadd.bf16 %v1618_v40, %v4622_v13  ;;  %v1611_v21 = vmax.bf16 %v4296_v18, %v1603_v6  ;;  %v4246_v6 = vld [vmem:[#allocation2 + $0x188] sm:$0xff]  }
 0x47a   :  { %v3838_v14 = vpop.f32.mrb[76].mxu0  ;;  %v1610_v16 = vmax.bf16 %v4296_v18, %v1602_v11  ;;  %3943 = vmatpush3.bf16.msra.mxu0 %v4240_v57  ;;  %v1635_v22 = vmax.bf16 %v4296_v18, %v1627_v9 }
 0x47b   :  { %v3870_v15 = vpop.f32.mrb[76].mxu1  ;;  %v1634_v17 = vmax.bf16 %v4296_v18, %v1626_v12  ;;  %3975 = vmatpush3.bf16.msra.mxu1 %v4240_v57  ;;  %v1474_v19 = vpop.f32.mrb[77].mxu0  ;;  %3944 = vmatprep.subr.bf16.mxu0 %v4241_v10 }
 0x47c   :  { %v1571_v20 = vpop.f32.mrb[77].mxu1  ;;  %3976 = vmatprep.subr.bf16.mxu1 %v4241_v10  ;;  %v3839_v24 = vpop.f32.mrb[78].mxu0  ;;  %3896 = vmatprep.mubr.bf16.mxu0 %v1610_v16 }
 0x47d   :  { %v3871_v25 = vpop.f32.mrb[78].mxu1  ;;  %3928 = vmatprep.mubr.bf16.mxu1 %v1634_v17  ;;  %v1593_v26 = vpack.c.bf16 %v3839_v24, %v3838_v14  ;;  %v1477_v28 = vpop.f32.mrb[79].mxu0  ;;  %3897 = vmatmul.mubr.bf16.gmra.mrb[88].mxu0 %v1611_v21  ;;  %v4247_v21 = vld [vmem:[#allocation2 + $0x190] sm:$0xff]  }
 0x47e   :  { %v1621_v27 = vpack.c.bf16 %v3871_v25, %v3870_v15  ;;  %v1574_v3 = vpop.f32.mrb[79].mxu1  ;;  %3929 = vmatmul.mubr.bf16.gmra.mrb[88].mxu1 %v1635_v22  ;;  %v1592_v29 = vpack.c.bf16 %v1477_v28, %v1474_v19  ;;  %3945 = vmatpush3.bf16.msra.mxu0 %v4241_v10 }
 0x47f   :  { %v1620_v30 = vpack.c.bf16 %v1574_v3, %v1571_v20  ;;  %3977 = vmatpush3.bf16.msra.mxu1 %v4241_v10  ;;  %v1605_v32 = vadd.bf16 %v4622_v13, %v1593_v26  ;;  %3946 = vmatprep.subr.bf16.mxu0 %v4242_v23 }
 0x480   :  { %v1629_v33 = vadd.bf16 %v1621_v27, %v4622_v13  ;;  %3978 = vmatprep.subr.bf16.mxu1 %v4242_v23  ;;  %v1604_v7 = vadd.bf16 %v4622_v13, %v1592_v29 }
 0x481   :  { %v1628_v34 = vadd.bf16 %v1620_v30, %v4622_v13  ;;  %v1613_v38 = vmax.bf16 %v4296_v18, %v1605_v32  ;;  %v4244_v13 = vld [vmem:[#allocation2 + $0x178] sm:$0xff]  }
 0x482   :  { %v1612_v35 = vmax.bf16 %v4296_v18, %v1604_v7  ;;  %3947 = vmatpush3.bf16.msra.mxu0 %v4242_v23  ;;  %v1637_v39 = vmax.bf16 %v4296_v18, %v1629_v33  ;;  %v4248_v32 = vld [vmem:[#allocation2 + $0x198] sm:$0xff]  }
 0x483   :  { %v1636_v37 = vmax.bf16 %v4296_v18, %v1628_v34  ;;  %3979 = vmatpush3.bf16.msra.mxu1 %v4242_v23  ;;  %3948 = vmatprep.subr.bf16.mxu0 %v4243_v41 }
 0x484   :  { %3900 = vmatprep.mubr.bf16.mxu0 %v1612_v35  ;;  %3980 = vmatprep.subr.bf16.mxu1 %v4243_v41 }
 0x485   :  { %3932 = vmatprep.mubr.bf16.mxu1 %v1636_v37  ;;  %3901 = vmatmul.mubr.bf16.gmra.mrb[92].mxu0 %v1613_v38 }
 0x486   :  { %3933 = vmatmul.mubr.bf16.gmra.mrb[92].mxu1 %v1637_v39  ;;  %3949 = vmatpush3.bf16.msra.mxu0 %v4243_v41 }
 0x487   :  { %3981 = vmatpush3.bf16.msra.mxu1 %v4243_v41  ;;  %3950 = vmatprep.subr.bf16.mxu0 %v4244_v13 }
 0x488   :  { %3982 = vmatprep.subr.bf16.mxu1 %v4244_v13 }
 0x48a   :  { %3951 = vmatpush3.bf16.msra.mxu0 %v4244_v13 }
 0x48b   :  { %3983 = vmatpush3.bf16.msra.mxu1 %v4244_v13  ;;  %4000 = vmatprep.subr.bf16.mxu0 %v4245_v42 }
 0x48c   :  { %4032 = vmatprep.subr.bf16.mxu1 %v4245_v42 }
 0x540   :  { %v3890_v43 = vpop.f32.mrb[80].mxu0 }
 0x541   :  { %v3922_v44 = vpop.f32.mrb[80].mxu1  ;;  %v1737_v60 = vpop.f32.mrb[81].mxu0 }
 0x542   :  { %v1834_v45 = vpop.f32.mrb[81].mxu1  ;;  %v3891_v47 = vpop.f32.mrb[82].mxu0 }
 0x543   :  { %v3923_v48 = vpop.f32.mrb[82].mxu1  ;;  %v1898_v49 = vpack.c.bf16 %v3891_v47, %v3890_v43  ;;  %v1740_v51 = vpop.f32.mrb[83].mxu0  ;;  %v4249_v43 = vld [vmem:[#allocation2 + $0x1a0] sm:$0xff]  }
 0x544   :  { %v1926_v50 = vpack.c.bf16 %v3923_v48, %v3922_v44  ;;  %v1837_v52 = vpop.f32.mrb[83].mxu1  ;;  %v1897_v53 = vpack.c.bf16 %v1740_v51, %v1737_v60 }
 0x545   :  { %v1925_v54 = vpack.c.bf16 %v1837_v52, %v1834_v45  ;;  %v1910_v55 = vadd.bf16 %v4659_v46, %v1898_v49 }
 0x546   :  { %v1934_v56 = vadd.bf16 %v1926_v50, %v4659_v46  ;;  %v1909_v57 = vadd.bf16 %v4659_v46, %v1897_v53 }
 0x547   :  { %v1933_v58 = vadd.bf16 %v1925_v54, %v4659_v46  ;;  %v1918_v2 = vmax.bf16 %v4296_v18, %v1910_v55  ;;  %v4250_v54 = vld [vmem:[#allocation2 + $0x1a8] sm:$0xff]  }
 0x548   :  { %v3894_v63 = vpop.f32.mrb[84].mxu0  ;;  %v1917_v8 = vmax.bf16 %v4296_v18, %v1909_v57  ;;  %v1942_v4 = vmax.bf16 %v4296_v18, %v1934_v56 }
 0x549   :  { %v3926_v36 = vpop.f32.mrb[84].mxu1  ;;  %v1941_v0 = vmax.bf16 %v4296_v18, %v1933_v58  ;;  %v1753_v5 = vpop.f32.mrb[85].mxu0 }
 0x54a   :  { %v1850_v40 = vpop.f32.mrb[85].mxu1  ;;  %v3895_v9 = vpop.f32.mrb[86].mxu0  ;;  %3952 = vmatprep.mubr.bf16.mxu0 %v1917_v8 }
 0x54b   :  { %v3927_v10 = vpop.f32.mrb[86].mxu1  ;;  %3984 = vmatprep.mubr.bf16.mxu1 %v1941_v0  ;;  %v1900_v11 = vpack.c.bf16 %v3895_v9, %v3894_v63  ;;  %v1756_v14 = vpop.f32.mrb[87].mxu0  ;;  %3953 = vmatmul.mubr.bf16.vlgmr.msra.gmra.mrb[96].mxu0 %v1918_v2 }
 0x54c   :  { %v1928_v12 = vpack.c.bf16 %v3927_v10, %v3926_v36  ;;  %v1853_v15 = vpop.f32.mrb[87].mxu1  ;;  %3985 = vmatmul.mubr.bf16.vlgmr.msra.gmra.mrb[96].mxu1 %v1942_v4  ;;  %v1899_v16 = vpack.c.bf16 %v1756_v14, %v1753_v5  ;;  %4001 = vmatpush3.bf16.msra.mxu0 %v4245_v42  ;;  %v4253_v14 = vld [vmem:[#allocation2 + $0x1c0] sm:$0xff]  }
 0x54d   :  { %v1927_v17 = vpack.c.bf16 %v1853_v15, %v1850_v40  ;;  %4033 = vmatpush3.bf16.msra.mxu1 %v4245_v42  ;;  %v1912_v19 = vadd.bf16 %v4659_v46, %v1900_v11  ;;  %4002 = vmatprep.subr.bf16.mxu0 %v4246_v6  ;;  %v2218_v15 = vsub.s32 3, %v4454_v59 }
 0x54e   :  { %v1936_v20 = vadd.bf16 %v1928_v12, %v4659_v46  ;;  %4034 = vmatprep.subr.bf16.mxu1 %v4246_v6  ;;  %v1911_v22 = vadd.bf16 %v4659_v46, %v1899_v16  ;;  %v4251_v12 = vld [vmem:[#allocation2 + $0x1b0] sm:$0xff]  }
 0x54f   :  { %v1935_v23 = vadd.bf16 %v1927_v17, %v4659_v46  ;;  %v1920_v29 = vmax.bf16 %v4296_v18, %v1912_v19 }
 0x550   :  { %v3898_v24 = vpop.f32.mrb[88].mxu0  ;;  %v1919_v26 = vmax.bf16 %v4296_v18, %v1911_v22  ;;  %4003 = vmatpush3.bf16.msra.mxu0 %v4246_v6  ;;  %v1944_v30 = vmax.bf16 %v4296_v18, %v1936_v20 }
 0x551   :  { %v3930_v25 = vpop.f32.mrb[88].mxu1  ;;  %v1943_v27 = vmax.bf16 %v4296_v18, %v1935_v23  ;;  %4035 = vmatpush3.bf16.msra.mxu1 %v4246_v6  ;;  %v1769_v28 = vpop.f32.mrb[89].mxu0  ;;  %4004 = vmatprep.subr.bf16.mxu0 %v4247_v21 }
 0x552   :  { %v1866_v3 = vpop.f32.mrb[89].mxu1  ;;  %4036 = vmatprep.subr.bf16.mxu1 %v4247_v21  ;;  %v3899_v33 = vpop.f32.mrb[90].mxu0  ;;  %3956 = vmatprep.mubr.bf16.mxu0 %v1919_v26 }
 0x553   :  { %v3931_v7 = vpop.f32.mrb[90].mxu1  ;;  %3988 = vmatprep.mubr.bf16.mxu1 %v1943_v27  ;;  %v1902_v34 = vpack.c.bf16 %v3899_v33, %v3898_v24  ;;  %v1772_v37 = vpop.f32.mrb[91].mxu0  ;;  %3957 = vmatmul.mubr.bf16.gmra.mrb[100].mxu0 %v1920_v29 }
 0x554   :  { %v1930_v35 = vpack.c.bf16 %v3931_v7, %v3930_v25  ;;  %v1869_v38 = vpop.f32.mrb[91].mxu1  ;;  %3989 = vmatmul.mubr.bf16.gmra.mrb[100].mxu1 %v1944_v30  ;;  %v1901_v39 = vpack.c.bf16 %v1772_v37, %v1769_v28  ;;  %4005 = vmatpush3.bf16.msra.mxu0 %v4247_v21 }
 0x555   :  { %v1929_v41 = vpack.c.bf16 %v1869_v38, %v1866_v3  ;;  %4037 = vmatpush3.bf16.msra.mxu1 %v4247_v21  ;;  %v1914_v13 = vadd.bf16 %v4659_v46, %v1902_v34  ;;  %4006 = vmatprep.subr.bf16.mxu0 %v4248_v32  ;;  %v4697_v21 = vrot.slane %v4463_v61, %v2218_v15 }
 0x556   :  { %v1938_v42 = vadd.bf16 %v1930_v35, %v4659_v46  ;;  %4038 = vmatprep.subr.bf16.mxu1 %v4248_v32  ;;  %v1913_v44 = vadd.bf16 %v4659_v46, %v1901_v39 }
 0x557   :  { %v1937_v60 = vadd.bf16 %v1929_v41, %v4659_v46  ;;  %v1922_v52 = vmax.bf16 %v4296_v18, %v1914_v13  ;;  %v4254_v13 = vld [vmem:[#allocation2 + $0x1c8] sm:$0xff]  }
 0x558   :  { %v3902_v45 = vpop.f32.mrb[92].mxu0  ;;  %v1921_v48 = vmax.bf16 %v4296_v18, %v1913_v44  ;;  %4007 = vmatpush3.bf16.msra.mxu0 %v4248_v32  ;;  %v1946_v53 = vmax.bf16 %v4296_v18, %v1938_v42 }
 0x559   :  { %v3934_v47 = vpop.f32.mrb[92].mxu1  ;;  %v1945_v49 = vmax.bf16 %v4296_v18, %v1937_v60  ;;  %4039 = vmatpush3.bf16.msra.mxu1 %v4248_v32  ;;  %v1785_v50 = vpop.f32.mrb[93].mxu0  ;;  %4008 = vmatprep.subr.bf16.mxu0 %v4249_v43 }
 0x55a   :  { %v1882_v51 = vpop.f32.mrb[93].mxu1  ;;  %4040 = vmatprep.subr.bf16.mxu1 %v4249_v43  ;;  %v3903_v55 = vpop.f32.mrb[94].mxu0  ;;  %3960 = vmatprep.mubr.bf16.mxu0 %v1921_v48 }
 0x55b   :  { %v3935_v56 = vpop.f32.mrb[94].mxu1  ;;  %3992 = vmatprep.mubr.bf16.mxu1 %v1945_v49  ;;  %v1904_v57 = vpack.c.bf16 %v3903_v55, %v3902_v45  ;;  %v1788_v63 = vpop.f32.mrb[95].mxu0  ;;  %3961 = vmatmul.mubr.bf16.gmra.mrb[104].mxu0 %v1922_v52  ;;  %v4255_v52 = vld [vmem:[#allocation2 + $0x1d0] sm:$0xff]  }
 0x55c   :  { %v1932_v58 = vpack.c.bf16 %v3935_v56, %v3934_v47  ;;  %v1885_v36 = vpop.f32.mrb[95].mxu1  ;;  %3993 = vmatmul.mubr.bf16.gmra.mrb[104].mxu1 %v1946_v53  ;;  %v1903_v8 = vpack.c.bf16 %v1788_v63, %v1785_v50  ;;  %4009 = vmatpush3.bf16.msra.mxu0 %v4249_v43 }
 0x55d   :  { %v1931_v0 = vpack.c.bf16 %v1885_v36, %v1882_v51  ;;  %4041 = vmatpush3.bf16.msra.mxu1 %v4249_v43  ;;  %v1916_v2 = vadd.bf16 %v4659_v46, %v1904_v57  ;;  %4010 = vmatprep.subr.bf16.mxu0 %v4250_v54 }
 0x55e   :  { %v1940_v4 = vadd.bf16 %v1932_v58, %v4659_v46  ;;  %4042 = vmatprep.subr.bf16.mxu1 %v4250_v54  ;;  %v1915_v5 = vadd.bf16 %v4659_v46, %v1903_v8 }
 0x55f   :  { %v1939_v40 = vadd.bf16 %v1931_v0, %v4659_v46  ;;  %v1924_v10 = vmax.bf16 %v4296_v18, %v1916_v2  ;;  %v4252_v46 = vld [vmem:[#allocation2 + $0x1b8] sm:$0xff]  }
 0x560   :  { %v1923_v6 = vmax.bf16 %v4296_v18, %v1915_v5  ;;  %4011 = vmatpush3.bf16.msra.mxu0 %v4250_v54  ;;  %v1948_v11 = vmax.bf16 %v4296_v18, %v1940_v4  ;;  %v4256_v2 = vld [vmem:[#allocation2 + $0x1d8] sm:$0xff]  }
 0x561   :  { %v1947_v9 = vmax.bf16 %v4296_v18, %v1939_v40  ;;  %4043 = vmatpush3.bf16.msra.mxu1 %v4250_v54  ;;  %4012 = vmatprep.subr.bf16.mxu0 %v4251_v12 }
 0x562   :  { %3964 = vmatprep.mubr.bf16.mxu0 %v1923_v6  ;;  %4044 = vmatprep.subr.bf16.mxu1 %v4251_v12 }
 0x563   :  { %3996 = vmatprep.mubr.bf16.mxu1 %v1947_v9  ;;  %3965 = vmatmul.mubr.bf16.gmra.mrb[108].mxu0 %v1924_v10 }
 0x564   :  { %3997 = vmatmul.mubr.bf16.gmra.mrb[108].mxu1 %v1948_v11  ;;  %4013 = vmatpush3.bf16.msra.mxu0 %v4251_v12 }
 0x565   :  { %4045 = vmatpush3.bf16.msra.mxu1 %v4251_v12  ;;  %4014 = vmatprep.subr.bf16.mxu0 %v4252_v46 }
 0x566   :  { %4046 = vmatprep.subr.bf16.mxu1 %v4252_v46 }
 0x568   :  { %4015 = vmatpush3.bf16.msra.mxu0 %v4252_v46 }
 0x569   :  { %4047 = vmatpush3.bf16.msra.mxu1 %v4252_v46  ;;  %4064 = vmatprep.subr.bf16.mxu0 %v4253_v14 }
 0x56a   :  { %4096 = vmatprep.subr.bf16.mxu1 %v4253_v14 }
 0x61e   :  { %v3954_v16 = vpop.f32.mrb[96].mxu0 }
 0x61f   :  { %v3986_v17 = vpop.f32.mrb[96].mxu1  ;;  %v2048_v19 = vpop.f32.mrb[97].mxu0 }
 0x620   :  { %v2145_v20 = vpop.f32.mrb[97].mxu1  ;;  %v3955_v22 = vpop.f32.mrb[98].mxu0 }
 0x621   :  { %v3987_v23 = vpop.f32.mrb[98].mxu1  ;;  %v2209_v24 = vpack.c.bf16 %v3955_v22, %v3954_v16  ;;  %v2051_v26 = vpop.f32.mrb[99].mxu0  ;;  %v4257_v16 = vld [vmem:[#allocation2 + $0x1e0] sm:$0xff]  }
 0x622   :  { %v2237_v25 = vpack.c.bf16 %v3987_v23, %v3986_v17  ;;  %v2148_v27 = vpop.f32.mrb[99].mxu1  ;;  %v2208_v28 = vpack.c.bf16 %v2051_v26, %v2048_v19 }
 0x623   :  { %v2236_v3 = vpack.c.bf16 %v2148_v27, %v2145_v20  ;;  %v2221_v29 = vadd.bf16 %v4697_v21, %v2209_v24 }
 0x624   :  { %v2245_v30 = vadd.bf16 %v2237_v25, %v4697_v21  ;;  %v2220_v32 = vadd.bf16 %v4697_v21, %v2208_v28 }
 0x625   :  { %v2244_v33 = vadd.bf16 %v2236_v3, %v4697_v21  ;;  %v2229_v37 = vmax.bf16 %v4296_v18, %v2221_v29  ;;  %v4258_v3 = vld [vmem:[#allocation2 + $0x1e8] sm:$0xff]  }
 0x626   :  { %v3958_v7 = vpop.f32.mrb[100].mxu0  ;;  %v2228_v61 = vmax.bf16 %v4296_v18, %v2220_v32  ;;  %v2253_v38 = vmax.bf16 %v4296_v18, %v2245_v30 }
 0x627   :  { %v3990_v34 = vpop.f32.mrb[100].mxu1  ;;  %v2252_v35 = vmax.bf16 %v4296_v18, %v2244_v33  ;;  %v2064_v39 = vpop.f32.mrb[101].mxu0 }
 0x628   :  { %v2161_v41 = vpop.f32.mrb[101].mxu1  ;;  %v3959_v42 = vpop.f32.mrb[102].mxu0  ;;  %4016 = vmatprep.mubr.bf16.mxu0 %v2228_v61 }
 0x629   :  { %v3991_v43 = vpop.f32.mrb[102].mxu1  ;;  %4048 = vmatprep.mubr.bf16.mxu1 %v2252_v35  ;;  %v2211_v44 = vpack.c.bf16 %v3959_v42, %v3958_v7  ;;  %v2067_v45 = vpop.f32.mrb[103].mxu0  ;;  %4017 = vmatmul.mubr.bf16.vlgmr.msra.gmra.mrb[112].mxu0 %v2229_v37 }
 0x62a   :  { %v2239_v60 = vpack.c.bf16 %v3991_v43, %v3990_v34  ;;  %v2164_v47 = vpop.f32.mrb[103].mxu1  ;;  %4049 = vmatmul.mubr.bf16.vlgmr.msra.gmra.mrb[112].mxu1 %v2253_v38  ;;  %v2210_v48 = vpack.c.bf16 %v2067_v45, %v2064_v39  ;;  %4065 = vmatpush3.bf16.msra.mxu0 %v4253_v14  ;;  %v4261_v45 = vld [vmem:[%s5001_s3] sm:$0xff]  }
 0x62b   :  { %v2238_v49 = vpack.c.bf16 %v2164_v47, %v2161_v41  ;;  %4097 = vmatpush3.bf16.msra.mxu1 %v4253_v14  ;;  %v2223_v50 = vadd.bf16 %v4697_v21, %v2211_v44  ;;  %4066 = vmatprep.subr.bf16.mxu0 %v4254_v13 }
 0x62c   :  { %v2247_v51 = vadd.bf16 %v2239_v60, %v4697_v21  ;;  %4098 = vmatprep.subr.bf16.mxu1 %v4254_v13  ;;  %v2222_v53 = vadd.bf16 %v4697_v21, %v2210_v48  ;;  %v4259_v60 = vld [vmem:[#allocation2 + $0x1f0] sm:$0xff]  }
 0x62d   :  { %v2246_v54 = vadd.bf16 %v2238_v49, %v4697_v21  ;;  %v2231_v8 = vmax.bf16 %v4296_v18, %v2223_v50 }
 0x62e   :  { %v3962_v55 = vpop.f32.mrb[104].mxu0  ;;  %v2230_v57 = vmax.bf16 %v4296_v18, %v2222_v53  ;;  %4067 = vmatpush3.bf16.msra.mxu0 %v4254_v13  ;;  %v2255_v0 = vmax.bf16 %v4296_v18, %v2247_v51  ;;  %v4737_v51 = vrot.slane %v4505_v31, %v2218_v15 }
 0x62f   :  { %v3994_v56 = vpop.f32.mrb[104].mxu1  ;;  %v2254_v58 = vmax.bf16 %v4296_v18, %v2246_v54  ;;  %4099 = vmatpush3.bf16.msra.mxu1 %v4254_v13  ;;  %v2080_v63 = vpop.f32.mrb[105].mxu0  ;;  %4068 = vmatprep.subr.bf16.mxu0 %v4255_v52 }
 0x630   :  { %v2177_v36 = vpop.f32.mrb[105].mxu1  ;;  %4100 = vmatprep.subr.bf16.mxu1 %v4255_v52  ;;  %v3963_v4 = vpop.f32.mrb[106].mxu0  ;;  %4020 = vmatprep.mubr.bf16.mxu0 %v2230_v57 }
 0x631   :  { %v3995_v5 = vpop.f32.mrb[106].mxu1  ;;  %4052 = vmatprep.mubr.bf16.mxu1 %v2254_v58  ;;  %v2213_v40 = vpack.c.bf16 %v3963_v4, %v3962_v55  ;;  %v2083_v9 = vpop.f32.mrb[107].mxu0  ;;  %4021 = vmatmul.mubr.bf16.gmra.mrb[116].mxu0 %v2231_v8 }
 0x632   :  { %v2241_v6 = vpack.c.bf16 %v3995_v5, %v3994_v56  ;;  %v2180_v10 = vpop.f32.mrb[107].mxu1  ;;  %4053 = vmatmul.mubr.bf16.gmra.mrb[116].mxu1 %v2255_v0  ;;  %v2212_v11 = vpack.c.bf16 %v2083_v9, %v2080_v63  ;;  %4069 = vmatpush3.bf16.msra.mxu0 %v4255_v52 }
 0x633   :  { %v2240_v12 = vpack.c.bf16 %v2180_v10, %v2177_v36  ;;  %4101 = vmatpush3.bf16.msra.mxu1 %v4255_v52  ;;  %v2225_v46 = vadd.bf16 %v4697_v21, %v2213_v40  ;;  %4070 = vmatprep.subr.bf16.mxu0 %v4256_v2  ;;  %v4262_v10 = vld [vmem:[%s5001_s3 + $0x8] sm:$0xff]  }
 0x634   :  { %v2249_v14 = vadd.bf16 %v2241_v6, %v4697_v21  ;;  %4102 = vmatprep.subr.bf16.mxu1 %v4256_v2  ;;  %v2224_v17 = vadd.bf16 %v4697_v21, %v2212_v11 }
 0x635   :  { %v2248_v19 = vadd.bf16 %v2240_v12, %v4697_v21  ;;  %v2233_v27 = vmax.bf16 %v4296_v18, %v2225_v46 }
 0x636   :  { %v3966_v20 = vpop.f32.mrb[108].mxu0  ;;  %v2232_v23 = vmax.bf16 %v4296_v18, %v2224_v17  ;;  %4071 = vmatpush3.bf16.msra.mxu0 %v4256_v2  ;;  %v2257_v28 = vmax.bf16 %v4296_v18, %v2249_v14 }
 0x637   :  { %v3998_v22 = vpop.f32.mrb[108].mxu1  ;;  %v2256_v24 = vmax.bf16 %v4296_v18, %v2248_v19  ;;  %4103 = vmatpush3.bf16.msra.mxu1 %v4256_v2  ;;  %v2096_v25 = vpop.f32.mrb[109].mxu0  ;;  %4072 = vmatprep.subr.bf16.mxu0 %v4257_v16 }
 0x638   :  { %v2193_v26 = vpop.f32.mrb[109].mxu1  ;;  %4104 = vmatprep.subr.bf16.mxu1 %v4257_v16  ;;  %v3967_v29 = vpop.f32.mrb[110].mxu0  ;;  %4024 = vmatprep.mubr.bf16.mxu0 %v2232_v23 }
 0x639   :  { %v3999_v30 = vpop.f32.mrb[110].mxu1  ;;  %4056 = vmatprep.mubr.bf16.mxu1 %v2256_v24  ;;  %v2215_v32 = vpack.c.bf16 %v3967_v29, %v3966_v20  ;;  %v2099_v7 = vpop.f32.mrb[111].mxu0  ;;  %4025 = vmatmul.mubr.bf16.gmra.mrb[120].mxu0 %v2233_v27  ;;  %v4263_v24 = vld [vmem:[%s5001_s3 + $0x10] sm:$0xff]  }
 0x63a   :  { %v2243_v33 = vpack.c.bf16 %v3999_v30, %v3998_v22  ;;  %v2196_v34 = vpop.f32.mrb[111].mxu1  ;;  %4057 = vmatmul.mubr.bf16.gmra.mrb[120].mxu1 %v2257_v28  ;;  %v2214_v61 = vpack.c.bf16 %v2099_v7, %v2096_v25  ;;  %4073 = vmatpush3.bf16.msra.mxu0 %v4257_v16 }
 0x63b   :  { %v2242_v35 = vpack.c.bf16 %v2196_v34, %v2193_v26  ;;  %4105 = vmatpush3.bf16.msra.mxu1 %v4257_v16  ;;  %v2227_v37 = vadd.bf16 %v4697_v21, %v2215_v32  ;;  %4074 = vmatprep.subr.bf16.mxu0 %v4258_v3  ;;  %v4264_v34 = vld [vmem:[%s5001_s3 + $0x18] sm:$0xff]  }
 0x63c   :  { %v2251_v38 = vadd.bf16 %v2243_v33, %v4697_v21  ;;  %4106 = vmatprep.subr.bf16.mxu1 %v4258_v3  ;;  %v2226_v39 = vadd.bf16 %v4697_v21, %v2214_v61 }
 0x63d   :  { %v2250_v41 = vadd.bf16 %v2242_v35, %v4697_v21  ;;  %v2235_v43 = vmax.bf16 %v4296_v18, %v2227_v37  ;;  %v4260_v21 = vld [vmem:[#allocation2 + $0x1f8] sm:$0xff]  }
 0x63e   :  { %v2234_v13 = vmax.bf16 %v4296_v18, %v2226_v39  ;;  %4075 = vmatpush3.bf16.msra.mxu0 %v4258_v3  ;;  %v2259_v44 = vmax.bf16 %v4296_v18, %v2251_v38 }
 0x63f   :  { %v2258_v42 = vmax.bf16 %v4296_v18, %v2250_v41  ;;  %4107 = vmatpush3.bf16.msra.mxu1 %v4258_v3  ;;  %4076 = vmatprep.subr.bf16.mxu0 %v4259_v60 }
 0x640   :  { %4028 = vmatprep.mubr.bf16.mxu0 %v2234_v13  ;;  %4108 = vmatprep.subr.bf16.mxu1 %v4259_v60 }
 0x641   :  { %4060 = vmatprep.mubr.bf16.mxu1 %v2258_v42  ;;  %4029 = vmatmul.mubr.bf16.gmra.mrb[124].mxu0 %v2235_v43 }
 0x642   :  { %4061 = vmatmul.mubr.bf16.gmra.mrb[124].mxu1 %v2259_v44  ;;  %4077 = vmatpush3.bf16.msra.mxu0 %v4259_v60 }
 0x643   :  { %4109 = vmatpush3.bf16.msra.mxu1 %v4259_v60  ;;  %4078 = vmatprep.subr.bf16.mxu0 %v4260_v21  ;;  %v4265_v60 = vld [vmem:[%s5001_s3 + $0x20] sm:$0xff]  }
 0x644   :  { %4110 = vmatprep.subr.bf16.mxu1 %v4260_v21 }
 0x646   :  { %4079 = vmatpush3.bf16.msra.mxu0 %v4260_v21 }
 0x647   :  { %4111 = vmatpush3.bf16.msra.mxu1 %v4260_v21  ;;  %4128 = vmatprep.subr.bf16.mxu0 %v4261_v45 }
 0x648   :  { %4160 = vmatprep.subr.bf16.mxu1 %v4261_v45 }
 0x6fc   :  { %v4018_v47 = vpop.f32.mrb[112].mxu0 }
 0x6fd   :  { %v4050_v48 = vpop.f32.mrb[112].mxu1  ;;  %v2359_v49 = vpop.f32.mrb[113].mxu0 }
 0x6fe   :  { %v2456_v50 = vpop.f32.mrb[113].mxu1  ;;  %v4019_v52 = vpop.f32.mrb[114].mxu0 }
 0x6ff   :  { %v4051_v53 = vpop.f32.mrb[114].mxu1  ;;  %v2520_v54 = vpack.c.bf16 %v4019_v52, %v4018_v47  ;;  %v2362_v56 = vpop.f32.mrb[115].mxu0 }
 0x700   :  { %v2548_v55 = vpack.c.bf16 %v4051_v53, %v4050_v48  ;;  %v2459_v57 = vpop.f32.mrb[115].mxu1  ;;  %v2519_v58 = vpack.c.bf16 %v2362_v56, %v2359_v49  ;;  %v4266_v56 = vld [vmem:[%s5001_s3 + $0x28] sm:$0xff]  }
 0x701   :  { %v2547_v63 = vpack.c.bf16 %v2459_v57, %v2456_v50  ;;  %v2532_v36 = vadd.bf16 %v4737_v51, %v2520_v54 }
 0x702   :  { %v2556_v8 = vadd.bf16 %v2548_v55, %v4737_v51  ;;  %v2531_v0 = vadd.bf16 %v4737_v51, %v2519_v58 }
 0x703   :  { %v2555_v2 = vadd.bf16 %v2547_v63, %v4737_v51  ;;  %v2540_v5 = vmax.bf16 %v4296_v18, %v2532_v36 }
 0x704   :  { %v4022_v59 = vpop.f32.mrb[116].mxu0  ;;  %v2539_v31 = vmax.bf16 %v4296_v18, %v2531_v0  ;;  %v2564_v40 = vmax.bf16 %v4296_v18, %v2556_v8 }
 0x705   :  { %v4054_v4 = vpop.f32.mrb[116].mxu1  ;;  %v2563_v15 = vmax.bf16 %v4296_v18, %v2555_v2  ;;  %v2375_v6 = vpop.f32.mrb[117].mxu0 }
 0x706   :  { %v2472_v9 = vpop.f32.mrb[117].mxu1  ;;  %v4023_v11 = vpop.f32.mrb[118].mxu0  ;;  %4080 = vmatprep.mubr.bf16.mxu0 %v2539_v31 }
 0x707   :  { %v4055_v12 = vpop.f32.mrb[118].mxu1  ;;  %4112 = vmatprep.mubr.bf16.mxu1 %v2563_v15  ;;  %v2522_v46 = vpack.c.bf16 %v4023_v11, %v4022_v59  ;;  %v2378_v16 = vpop.f32.mrb[119].mxu0  ;;  %4081 = vmatmul.mubr.bf16.vlgmr.msra.gmra.mrb[128].mxu0 %v2540_v5  ;;  %v4267_v11 = vld [vmem:[%s5001_s3 + $0x30] sm:$0xff]  }
 0x708   :  { %v2550_v14 = vpack.c.bf16 %v4055_v12, %v4054_v4  ;;  %v2475_v17 = vpop.f32.mrb[119].mxu1  ;;  %4113 = vmatmul.mubr.bf16.vlgmr.msra.gmra.mrb[128].mxu1 %v2564_v40  ;;  %v2521_v19 = vpack.c.bf16 %v2378_v16, %v2375_v6  ;;  %4129 = vmatpush3.bf16.msra.mxu0 %v4261_v45  ;;  %v4795_v12 = vld [vmem:[%s5002_s4 + $0x4] sm:$0x1] }
 0x709   :  { %v2549_v20 = vpack.c.bf16 %v2475_v17, %v2472_v9  ;;  %4161 = vmatpush3.bf16.msra.mxu1 %v4261_v45  ;;  %v2534_v22 = vadd.bf16 %v4737_v51, %v2522_v46  ;;  %4130 = vmatprep.subr.bf16.mxu0 %v4262_v10  ;;  %v2839_v46 = vpack.i.b16 %v4795_v12, %v4795_v12 }
 0x70a   :  { %v2558_v23 = vadd.bf16 %v2550_v14, %v4737_v51  ;;  %4162 = vmatprep.subr.bf16.mxu1 %v4262_v10  ;;  %v2533_v25 = vadd.bf16 %v4737_v51, %v2521_v19 }
 0x70b   :  { %v2557_v26 = vadd.bf16 %v2549_v20, %v4737_v51  ;;  %v2542_v33 = vmax.bf16 %v4296_v18, %v2534_v22  ;;  %v4800_v20 = vrot.slane %v2839_v46, %v4466_v62 }
 0x70c   :  { %v4026_v27 = vpop.f32.mrb[120].mxu0  ;;  %v2541_v3 = vmax.bf16 %v4296_v18, %v2533_v25  ;;  %4131 = vmatpush3.bf16.msra.mxu0 %v4262_v10  ;;  %v2566_v7 = vmax.bf16 %v4296_v18, %v2558_v23 }
 0x70d   :  { %v4058_v28 = vpop.f32.mrb[120].mxu1  ;;  %v2565_v29 = vmax.bf16 %v4296_v18, %v2557_v26  ;;  %4163 = vmatpush3.bf16.msra.mxu1 %v4262_v10  ;;  %v2391_v30 = vpop.f32.mrb[121].mxu0  ;;  %4132 = vmatprep.subr.bf16.mxu0 %v4263_v24 }
 0x70e   :  { %v2488_v32 = vpop.f32.mrb[121].mxu1  ;;  %4164 = vmatprep.subr.bf16.mxu1 %v4263_v24  ;;  %v4027_v61 = vpop.f32.mrb[122].mxu0  ;;  %4084 = vmatprep.mubr.bf16.mxu0 %v2541_v3 }
 0x70f   :  { %v4059_v35 = vpop.f32.mrb[122].mxu1  ;;  %4116 = vmatprep.mubr.bf16.mxu1 %v2565_v29  ;;  %v2524_v37 = vpack.c.bf16 %v4027_v61, %v4026_v27  ;;  %v2394_v39 = vpop.f32.mrb[123].mxu0  ;;  %4085 = vmatmul.mubr.bf16.gmra.mrb[132].mxu0 %v2542_v33 }
 0x710   :  { %v2552_v38 = vpack.c.bf16 %v4059_v35, %v4058_v28  ;;  %v2491_v41 = vpop.f32.mrb[123].mxu1  ;;  %4117 = vmatmul.mubr.bf16.gmra.mrb[132].mxu1 %v2566_v7  ;;  %v2523_v13 = vpack.c.bf16 %v2394_v39, %v2391_v30  ;;  %4133 = vmatpush3.bf16.msra.mxu0 %v4263_v24 }
 0x711   :  { %v2551_v42 = vpack.c.bf16 %v2491_v41, %v2488_v32  ;;  %4165 = vmatpush3.bf16.msra.mxu1 %v4263_v24  ;;  %v2536_v43 = vadd.bf16 %v4737_v51, %v2524_v37  ;;  %4134 = vmatprep.subr.bf16.mxu0 %v4264_v34 }
 0x712   :  { %v2560_v44 = vadd.bf16 %v2552_v38, %v4737_v51  ;;  %4166 = vmatprep.subr.bf16.mxu1 %v4264_v34  ;;  %v2535_v21 = vadd.bf16 %v4737_v51, %v2523_v13 }
 0x713   :  { %v2559_v45 = vadd.bf16 %v2551_v42, %v4737_v51  ;;  %v2544_v54 = vmax.bf16 %v4296_v18, %v2536_v43 }
 0x714   :  { %v4030_v47 = vpop.f32.mrb[124].mxu0  ;;  %v2543_v49 = vmax.bf16 %v4296_v18, %v2535_v21  ;;  %4135 = vmatpush3.bf16.msra.mxu0 %v4264_v34  ;;  %v2568_v55 = vmax.bf16 %v4296_v18, %v2560_v44 }
 0x715   :  { %v4062_v48 = vpop.f32.mrb[124].mxu1  ;;  %v2567_v50 = vmax.bf16 %v4296_v18, %v2559_v45  ;;  %4167 = vmatpush3.bf16.msra.mxu1 %v4264_v34  ;;  %v2407_v52 = vpop.f32.mrb[125].mxu0  ;;  %4136 = vmatprep.subr.bf16.mxu0 %v4265_v60 }
 0x716   :  { %v2504_v53 = vpop.f32.mrb[125].mxu1  ;;  %4168 = vmatprep.subr.bf16.mxu1 %v4265_v60  ;;  %v4031_v57 = vpop.f32.mrb[126].mxu0  ;;  %4088 = vmatprep.mubr.bf16.mxu0 %v2543_v49 }
 0x717   :  { %v4063_v58 = vpop.f32.mrb[126].mxu1  ;;  %4120 = vmatprep.mubr.bf16.mxu1 %v2567_v50  ;;  %v2526_v63 = vpack.c.bf16 %v4031_v57, %v4030_v47  ;;  %v2410_v8 = vpop.f32.mrb[127].mxu0  ;;  %4089 = vmatmul.mubr.bf16.gmra.mrb[136].mxu0 %v2544_v54 }
 0x718   :  { %v2554_v36 = vpack.c.bf16 %v4063_v58, %v4062_v48  ;;  %v2507_v0 = vpop.f32.mrb[127].mxu1  ;;  %4121 = vmatmul.mubr.bf16.gmra.mrb[136].mxu1 %v2568_v55  ;;  %v2525_v2 = vpack.c.bf16 %v2410_v8, %v2407_v52  ;;  %4137 = vmatpush3.bf16.msra.mxu0 %v4265_v60 }
 0x719   :  { %v2553_v59 = vpack.c.bf16 %v2507_v0, %v2504_v53  ;;  %4169 = vmatpush3.bf16.msra.mxu1 %v4265_v60  ;;  %v2538_v4 = vadd.bf16 %v4737_v51, %v2526_v63  ;;  %4138 = vmatprep.subr.bf16.mxu0 %v4266_v56 }
 0x71a   :  { %v2562_v31 = vadd.bf16 %v2554_v36, %v4737_v51  ;;  %4170 = vmatprep.subr.bf16.mxu1 %v4266_v56  ;;  %v2537_v15 = vadd.bf16 %v4737_v51, %v2525_v2 }
 0x71b   :  { %v2561_v5 = vadd.bf16 %v2553_v59, %v4737_v51  ;;  %v2546_v9 = vmax.bf16 %v4296_v18, %v2538_v4  ;;  %v4268_v51 = vld [vmem:[%s5001_s3 + $0x38] sm:$0xff]  }
 0x71c   :  { %v2545_v40 = vmax.bf16 %v4296_v18, %v2537_v15  ;;  %4139 = vmatpush3.bf16.msra.mxu0 %v4266_v56  ;;  %v2570_v10 = vmax.bf16 %v4296_v18, %v2562_v31 }
 0x71d   :  { %v2569_v6 = vmax.bf16 %v4296_v18, %v2561_v5  ;;  %4171 = vmatpush3.bf16.msra.mxu1 %v4266_v56  ;;  %4140 = vmatprep.subr.bf16.mxu0 %v4267_v11 }
 0x71e   :  { %4092 = vmatprep.mubr.bf16.mxu0 %v2545_v40  ;;  %4172 = vmatprep.subr.bf16.mxu1 %v4267_v11 }
 0x71f   :  { %4124 = vmatprep.mubr.bf16.mxu1 %v2569_v6  ;;  %4093 = vmatmul.mubr.bf16.gmra.mrb[140].mxu0 %v2546_v9 }
 0x720   :  { %4125 = vmatmul.mubr.bf16.gmra.mrb[140].mxu1 %v2570_v10  ;;  %4141 = vmatpush3.bf16.msra.mxu0 %v4267_v11 }
 0x721   :  { %4173 = vmatpush3.bf16.msra.mxu1 %v4267_v11  ;;  %4142 = vmatprep.subr.bf16.mxu0 %v4268_v51 }
 0x722   :  { %4174 = vmatprep.subr.bf16.mxu1 %v4268_v51 }
 0x724   :  { %4143 = vmatpush3.bf16.msra.mxu0 %v4268_v51 }
 0x725   :  { %4175 = vmatpush3.bf16.msra.mxu1 %v4268_v51 }
 0x7da   :  { %v4082_v14 = vpop.f32.mrb[128].mxu0 }
 0x7db   :  { %v4114_v16 = vpop.f32.mrb[128].mxu1  ;;  %v2670_v17 = vpop.f32.mrb[129].mxu0 }
 0x7dc   :  { %v2767_v19 = vpop.f32.mrb[129].mxu1  ;;  %v4083_v22 = vpop.f32.mrb[130].mxu0 }
 0x7dd   :  { %v4115_v23 = vpop.f32.mrb[130].mxu1  ;;  %v2831_v24 = vpack.c.bf16 %v4083_v22, %v4082_v14  ;;  %v2673_v26 = vpop.f32.mrb[131].mxu0 }
 0x7de   :  { %v2862_v25 = vpack.c.bf16 %v4115_v23, %v4114_v16  ;;  %v2770_v27 = vpop.f32.mrb[131].mxu1  ;;  %v2830_v28 = vpack.c.bf16 %v2673_v26, %v2670_v17 }
 0x7df   :  { %v2861_v3 = vpack.c.bf16 %v2770_v27, %v2767_v19  ;;  %v2846_v29 = vadd.bf16 %v4800_v20, %v2831_v24 }
 0x7e0   :  { %v2870_v30 = vadd.bf16 %v2862_v25, %v4800_v20  ;;  %v2845_v32 = vadd.bf16 %v4800_v20, %v2830_v28 }
 0x7e1   :  { %v2869_v33 = vadd.bf16 %v2861_v3, %v4800_v20  ;;  %v2854_v35 = vmax.bf16 %v4296_v18, %v2846_v29 }
 0x7e2   :  { %v4086_v7 = vpop.f32.mrb[132].mxu0  ;;  %v2853_v62 = vmax.bf16 %v4296_v18, %v2845_v32  ;;  %v2878_v37 = vmax.bf16 %v4296_v18, %v2870_v30 }
 0x7e3   :  { %v4118_v34 = vpop.f32.mrb[132].mxu1  ;;  %v2877_v61 = vmax.bf16 %v4296_v18, %v2869_v33  ;;  %v2686_v38 = vpop.f32.mrb[133].mxu0 }
 0x7e4   :  { %v2783_v39 = vpop.f32.mrb[133].mxu1  ;;  %v4087_v41 = vpop.f32.mrb[134].mxu0  ;;  %4144 = vmatprep.mubr.bf16.mxu0 %v2853_v62 }
 0x7e5   :  { %v4119_v13 = vpop.f32.mrb[134].mxu1  ;;  %4176 = vmatprep.mubr.bf16.mxu1 %v2877_v61  ;;  %v2833_v42 = vpack.c.bf16 %v4087_v41, %v4086_v7  ;;  %v2689_v44 = vpop.f32.mrb[135].mxu0  ;;  %4145 = vmatmul.mubr.bf16.vlgmr.msra.gmra.mrb[144].mxu0 %v2854_v35  ;;  %v37_v35 = vunpack.c.l.bf16 %v4795_v12 }
 0x7e6   :  { %v2864_v43 = vpack.c.bf16 %v4119_v13, %v4118_v34  ;;  %v2786_v60 = vpop.f32.mrb[135].mxu1  ;;  %4177 = vmatmul.mubr.bf16.vlgmr.msra.gmra.mrb[144].mxu1 %v2878_v37  ;;  %v2832_v21 = vpack.c.bf16 %v2689_v44, %v2686_v38 }
 0x7e7   :  { %v2863_v45 = vpack.c.bf16 %v2786_v60, %v2783_v39  ;;  %v2848_v47 = vadd.bf16 %v4800_v20, %v2833_v42  ;;  %v4836_v37 = vrot.slane %v37_v35, %v4544_v1 }
 0x7e8   :  { %v2872_v48 = vadd.bf16 %v2864_v43, %v4800_v20  ;;  %v2847_v49 = vadd.bf16 %v4800_v20, %v2832_v21 }
 0x7e9   :  { %v2871_v50 = vadd.bf16 %v2863_v45, %v4800_v20  ;;  %v2856_v58 = vmax.bf16 %v4296_v18, %v2848_v47 }
 0x7ea   :  { %v4090_v52 = vpop.f32.mrb[136].mxu0  ;;  %v2855_v54 = vmax.bf16 %v4296_v18, %v2847_v49  ;;  %v2880_v63 = vmax.bf16 %v4296_v18, %v2872_v48 }
 0x7eb   :  { %v4122_v53 = vpop.f32.mrb[136].mxu1  ;;  %v2879_v55 = vmax.bf16 %v4296_v18, %v2871_v50  ;;  %v2702_v56 = vpop.f32.mrb[137].mxu0 }
 0x7ec   :  { %v2799_v57 = vpop.f32.mrb[137].mxu1  ;;  %v4091_v36 = vpop.f32.mrb[138].mxu0  ;;  %4148 = vmatprep.mubr.bf16.mxu0 %v2855_v54 }
 0x7ed   :  { %v4123_v8 = vpop.f32.mrb[138].mxu1  ;;  %4180 = vmatprep.mubr.bf16.mxu1 %v2879_v55  ;;  %v2835_v0 = vpack.c.bf16 %v4091_v36, %v4090_v52  ;;  %v2705_v59 = vpop.f32.mrb[139].mxu0  ;;  %4149 = vmatmul.mubr.bf16.gmra.mrb[148].mxu0 %v2856_v58 }
 0x7ee   :  { %v2866_v2 = vpack.c.bf16 %v4123_v8, %v4122_v53  ;;  %v2802_v4 = vpop.f32.mrb[139].mxu1  ;;  %4181 = vmatmul.mubr.bf16.gmra.mrb[148].mxu1 %v2880_v63  ;;  %v2834_v31 = vpack.c.bf16 %v2705_v59, %v2702_v56 }
 0x7ef   :  { %v2865_v15 = vpack.c.bf16 %v2802_v4, %v2799_v57  ;;  %v2850_v5 = vadd.bf16 %v4800_v20, %v2835_v0 }
 0x7f0   :  { %v2874_v40 = vadd.bf16 %v2866_v2, %v4800_v20  ;;  %v2849_v6 = vadd.bf16 %v4800_v20, %v2834_v31 }
 0x7f1   :  { %v2873_v9 = vadd.bf16 %v2865_v15, %v4800_v20  ;;  %v2858_v17 = vmax.bf16 %v4296_v18, %v2850_v5 }
 0x7f2   :  { %v4094_v10 = vpop.f32.mrb[140].mxu0  ;;  %v2857_v51 = vmax.bf16 %v4296_v18, %v2849_v6  ;;  %v2882_v19 = vmax.bf16 %v4296_v18, %v2874_v40 }
 0x7f3   :  { %v4126_v11 = vpop.f32.mrb[140].mxu1  ;;  %v2881_v46 = vmax.bf16 %v4296_v18, %v2873_v9  ;;  %v2718_v14 = vpop.f32.mrb[141].mxu0 }
 0x7f4   :  { %v2815_v16 = vpop.f32.mrb[141].mxu1  ;;  %v4095_v22 = vpop.f32.mrb[142].mxu0  ;;  %4152 = vmatprep.mubr.bf16.mxu0 %v2857_v51 }
 0x7f5   :  { %v4127_v23 = vpop.f32.mrb[142].mxu1  ;;  %4184 = vmatprep.mubr.bf16.mxu1 %v2881_v46  ;;  %v2837_v24 = vpack.c.bf16 %v4095_v22, %v4094_v10  ;;  %v2721_v26 = vpop.f32.mrb[143].mxu0  ;;  %4153 = vmatmul.mubr.bf16.gmra.mrb[152].mxu0 %v2858_v17 }
 0x7f6   :  { %v2868_v25 = vpack.c.bf16 %v4127_v23, %v4126_v11  ;;  %v2818_v27 = vpop.f32.mrb[143].mxu1  ;;  %4185 = vmatmul.mubr.bf16.gmra.mrb[152].mxu1 %v2882_v19  ;;  %v2836_v28 = vpack.c.bf16 %v2721_v26, %v2718_v14 }
 0x7f7   :  { %v2867_v3 = vpack.c.bf16 %v2818_v27, %v2815_v16  ;;  %v2852_v29 = vadd.bf16 %v4800_v20, %v2837_v24 }
 0x7f8   :  { %v2876_v30 = vadd.bf16 %v2868_v25, %v4800_v20  ;;  %v2851_v32 = vadd.bf16 %v4800_v20, %v2836_v28 }
 0x7f9   :  { %v2875_v33 = vadd.bf16 %v2867_v3, %v4800_v20  ;;  %v2860_v62 = vmax.bf16 %v4296_v18, %v2852_v29 }
 0x7fa   :  { %v2859_v7 = vmax.bf16 %v4296_v18, %v2851_v32  ;;  %v2884_v61 = vmax.bf16 %v4296_v18, %v2876_v30 }
 0x7fb   :  { %v2883_v34 = vmax.bf16 %v4296_v18, %v2875_v33 }
 0x7fc   :  { %4156 = vmatprep.mubr.bf16.mxu0 %v2859_v7 }
 0x7fd   :  { %4188 = vmatprep.mubr.bf16.mxu1 %v2883_v34  ;;  %4157 = vmatmul.mubr.bf16.gmra.mrb[156].mxu0 %v2860_v62 }
 0x7fe   :  { %4189 = vmatmul.mubr.bf16.gmra.mrb[156].mxu1 %v2884_v61 }
 0x8b8   :  { %v4146_v38 = vpop.f32.mrb[144].mxu0 }
 0x8b9   :  { %v4178_v20 = vpop.f32.mrb[144].mxu1  ;;  %v2996_v39 = vadd.f32 %v4146_v38, %v4836_v37  ;;  %v2987_v13 = vpop.f32.mrb[145].mxu0 }
 0x8ba   :  { %v3110_v41 = vadd.f32 %v4178_v20, %v4836_v37  ;;  %v3101_v42 = vpop.f32.mrb[145].mxu1  ;;  %v2988_v18 = vadd.f32 %v2987_v13, %v4836_v37  ;;  %v4147_v44 = vpop.f32.mrb[146].mxu0 }
 0x8bb   :  { %v3102_v43 = vadd.f32 %v3101_v42, %v4836_v37  ;;  %v4179_v60 = vpop.f32.mrb[146].mxu1  ;;  %3053 = vst.msk [vmem:[%s5003_s5 + $0x10] sm:$0xff] %vm3050_vm1, %v2996_v39  ;;  %v2999_v1 = vadd.f32 %v4147_v44, %v4836_v37  ;;  %v2990_v21 = vpop.f32.mrb[147].mxu0 }
 0x8bc   :  { %3166 = vst.msk [vmem:[%s5003_s5 + $0x90] sm:$0xff] %vm3050_vm1, %v3110_v41  ;;  %v3113_v12 = vadd.f32 %v4179_v60, %v4836_v37  ;;  %v3104_v45 = vpop.f32.mrb[147].mxu1  ;;  %3051 = vst.msk [vmem:[%s5003_s5] sm:$0xff] %vm3050_vm1, %v2988_v18  ;;  %v2991_v47 = vadd.f32 %v2990_v21, %v4836_v37 }
 0x8bd   :  { %3164 = vst.msk [vmem:[%s5003_s5 + $0x80] sm:$0xff] %vm3050_vm1, %v3102_v43  ;;  %v3105_v48 = vadd.f32 %v3104_v45, %v4836_v37  ;;  %3054 = vst.msk [vmem:[%s5003_s5 + $0x18] sm:$0xff] %vm3050_vm1, %v2999_v1 }
 0x8be   :  { %3167 = vst.msk [vmem:[%s5003_s5 + $0x98] sm:$0xff] %vm3050_vm1, %v3113_v12  ;;  %3052 = vst.msk [vmem:[%s5003_s5 + $0x8] sm:$0xff] %vm3050_vm1, %v2991_v47 }
 0x8bf   :  { %3165 = vst.msk [vmem:[%s5003_s5 + $0x88] sm:$0xff] %vm3050_vm1, %v3105_v48 }
 0x8c0   :  { %v4150_v49 = vpop.f32.mrb[148].mxu0 }
 0x8c1   :  { %v4182_v50 = vpop.f32.mrb[148].mxu1  ;;  %v3012_v52 = vadd.f32 %v4150_v49, %v4836_v37  ;;  %v3003_v54 = vpop.f32.mrb[149].mxu0 }
 0x8c2   :  { %v3126_v53 = vadd.f32 %v4182_v50, %v4836_v37  ;;  %v3117_v55 = vpop.f32.mrb[149].mxu1  ;;  %v3004_v56 = vadd.f32 %v3003_v54, %v4836_v37  ;;  %v4151_v58 = vpop.f32.mrb[150].mxu0 }
 0x8c3   :  { %v3118_v57 = vadd.f32 %v3117_v55, %v4836_v37  ;;  %v4183_v63 = vpop.f32.mrb[150].mxu1  ;;  %3057 = vst.msk [vmem:[%s5003_s5 + $0x30] sm:$0xff] %vm3050_vm1, %v3012_v52  ;;  %v3015_v36 = vadd.f32 %v4151_v58, %v4836_v37  ;;  %v3006_v0 = vpop.f32.mrb[151].mxu0 }
 0x8c4   :  { %3170 = vst.msk [vmem:[%s5003_s5 + $0xb0] sm:$0xff] %vm3050_vm1, %v3126_v53  ;;  %v3129_v8 = vadd.f32 %v4183_v63, %v4836_v37  ;;  %v3120_v2 = vpop.f32.mrb[151].mxu1  ;;  %3055 = vst.msk [vmem:[%s5003_s5 + $0x20] sm:$0xff] %vm3050_vm1, %v3004_v56  ;;  %v3007_v59 = vadd.f32 %v3006_v0, %v4836_v37 }
 0x8c5   :  { %3168 = vst.msk [vmem:[%s5003_s5 + $0xa0] sm:$0xff] %vm3050_vm1, %v3118_v57  ;;  %v3121_v4 = vadd.f32 %v3120_v2, %v4836_v37  ;;  %3058 = vst.msk [vmem:[%s5003_s5 + $0x38] sm:$0xff] %vm3050_vm1, %v3015_v36 }
 0x8c6   :  { %3171 = vst.msk [vmem:[%s5003_s5 + $0xb8] sm:$0xff] %vm3050_vm1, %v3129_v8  ;;  %3056 = vst.msk [vmem:[%s5003_s5 + $0x28] sm:$0xff] %vm3050_vm1, %v3007_v59 }
 0x8c7   :  { %3169 = vst.msk [vmem:[%s5003_s5 + $0xa8] sm:$0xff] %vm3050_vm1, %v3121_v4 }
 0x8c8   :  { %v4154_v31 = vpop.f32.mrb[152].mxu0 }
 0x8c9   :  { %v4186_v15 = vpop.f32.mrb[152].mxu1  ;;  %v3028_v5 = vadd.f32 %v4154_v31, %v4836_v37  ;;  %v3019_v6 = vpop.f32.mrb[153].mxu0 }
 0x8ca   :  { %v3142_v40 = vadd.f32 %v4186_v15, %v4836_v37  ;;  %v3133_v9 = vpop.f32.mrb[153].mxu1  ;;  %v3020_v10 = vadd.f32 %v3019_v6, %v4836_v37  ;;  %v4155_v51 = vpop.f32.mrb[154].mxu0 }
 0x8cb   :  { %v3134_v11 = vadd.f32 %v3133_v9, %v4836_v37  ;;  %v4187_v46 = vpop.f32.mrb[154].mxu1  ;;  %3061 = vst.msk [vmem:[%s5003_s5 + $0x50] sm:$0xff] %vm3050_vm1, %v3028_v5  ;;  %v3031_v14 = vadd.f32 %v4155_v51, %v4836_v37  ;;  %v3022_v17 = vpop.f32.mrb[155].mxu0 }
 0x8cc   :  { %3174 = vst.msk [vmem:[%s5003_s5 + $0xd0] sm:$0xff] %vm3050_vm1, %v3142_v40  ;;  %v3145_v16 = vadd.f32 %v4187_v46, %v4836_v37  ;;  %v3136_v19 = vpop.f32.mrb[155].mxu1  ;;  %3059 = vst.msk [vmem:[%s5003_s5 + $0x40] sm:$0xff] %vm3050_vm1, %v3020_v10  ;;  %v3023_v22 = vadd.f32 %v3022_v17, %v4836_v37 }
 0x8cd   :  { %3172 = vst.msk [vmem:[%s5003_s5 + $0xc0] sm:$0xff] %vm3050_vm1, %v3134_v11  ;;  %v3137_v23 = vadd.f32 %v3136_v19, %v4836_v37  ;;  %3062 = vst.msk [vmem:[%s5003_s5 + $0x58] sm:$0xff] %vm3050_vm1, %v3031_v14 }
 0x8ce   :  { %3175 = vst.msk [vmem:[%s5003_s5 + $0xd8] sm:$0xff] %vm3050_vm1, %v3145_v16  ;;  %3060 = vst.msk [vmem:[%s5003_s5 + $0x48] sm:$0xff] %vm3050_vm1, %v3023_v22 }
 0x8cf   :  { %3173 = vst.msk [vmem:[%s5003_s5 + $0xc8] sm:$0xff] %vm3050_vm1, %v3137_v23 }
 0x8d0   :  { %v4158_v24 = vpop.f32.mrb[156].mxu0 }
 0x8d1   :  { %v4190_v25 = vpop.f32.mrb[156].mxu1  ;;  %v3044_v26 = vadd.f32 %v4158_v24, %v4836_v37  ;;  %v3035_v28 = vpop.f32.mrb[157].mxu0 }
 0x8d2   :  { %v3158_v27 = vadd.f32 %v4190_v25, %v4836_v37  ;;  %v3149_v3 = vpop.f32.mrb[157].mxu1  ;;  %v3036_v29 = vadd.f32 %v3035_v28, %v4836_v37  ;;  %v4159_v32 = vpop.f32.mrb[158].mxu0 }
 0x8d3   :  { %v3150_v30 = vadd.f32 %v3149_v3, %v4836_v37  ;;  %v4191_v33 = vpop.f32.mrb[158].mxu1  ;;  %3065 = vst.msk [vmem:[%s5003_s5 + $0x70] sm:$0xff] %vm3050_vm1, %v3044_v26  ;;  %v3047_v7 = vadd.f32 %v4159_v32, %v4836_v37  ;;  %v3038_v62 = vpop.f32.mrb[159].mxu0 }
 0x8d4   :  { %3178 = vst.msk [vmem:[%s5003_s5 + $0xf0] sm:$0xff] %vm3050_vm1, %v3158_v27  ;;  %v3161_v34 = vadd.f32 %v4191_v33, %v4836_v37  ;;  %v3152_v61 = vpop.f32.mrb[159].mxu1  ;;  %3063 = vst.msk [vmem:[%s5003_s5 + $0x60] sm:$0xff] %vm3050_vm1, %v3036_v29  ;;  %v3039_v35 = vadd.f32 %v3038_v62, %v4836_v37 }
 0x8d5   :  { %3176 = vst.msk [vmem:[%s5003_s5 + $0xe0] sm:$0xff] %vm3050_vm1, %v3150_v30  ;;  %v3153_v38 = vadd.f32 %v3152_v61, %v4836_v37  ;;  %3066 = vst.msk [vmem:[%s5003_s5 + $0x78] sm:$0xff] %vm3050_vm1, %v3047_v7 }
 0x8d6   :  { %3179 = vst.msk [vmem:[%s5003_s5 + $0xf8] sm:$0xff] %vm3050_vm1, %v3161_v34  ;;  %3064 = vst.msk [vmem:[%s5003_s5 + $0x68] sm:$0xff] %vm3050_vm1, %v3039_v35 }
 0x8d7   :  { %3177 = vst.msk [vmem:[%s5003_s5 + $0xe8] sm:$0xff] %vm3050_vm1, %v3153_v38 }
 0x8d8   :  { %3184 = vsyncpa [#allocation3], 1 }

</bundles_post_ra>
